<compile_context>
chip_gen: v7x
topology: tpu7x:2x2x1
jax: 0.10.0
libtpu: 0.0.40
codegen_flags: <defaults>
</compile_context>

<pallas_src>
import math

import jax
import jax.numpy as jnp
from jax import lax
from jax.experimental import pallas as pl
from jax.experimental.pallas import tpu as pltpu

_INV_SQRT2 = 1.0 / math.sqrt(2.0)
_LN_EPS = 1e-5  # torch.nn.LayerNorm default


# ---------------------------------------------------------------------------
# Fused kernel: every Linear, GELU and LayerNorm of the MLP in one kernel
# body, so hidden activations never leave VMEM / vregs.
# ---------------------------------------------------------------------------
def _make_fused_mlp_kernel(n_layers):
    n_norm = max(n_layers - 1, 0)

    def kernel(*refs):
        # refs: x, w_0..w_{L-1}, gamma_0, beta_0, ..., gamma_{L-2}, beta_{L-2}, out
        x_ref = refs[0]
        w_refs = refs[1:1 + n_layers]
        gb_refs = refs[1 + n_layers:1 + n_layers + 2 * n_norm]
        o_ref = refs[-1]

        h = x_ref[...]  # bf16 tile straight from the wrapper (no f32 detour)
        for i in range(n_layers):
            w = w_refs[i][...]
            # MXU matmul: bf16 operands, f32 accumulation.
            h = jnp.dot(h.astype(w.dtype), w,
                        preferred_element_type=jnp.float32)
            if i < n_layers - 1:
                # Exact GELU (erf form), matching PyTorch F.gelu() default.
                # TODO(synk): tanh-approx GELU would move this onto the EUP on
                # v6e/v7x, but changes numerics vs the PyTorch module.
                g = 0.5 * h * (1.0 + lax.erf(h * _INV_SQRT2))
                # One-pass LayerNorm statistics: var = E[g^2] - E[g]^2 (f32).
                mean = jnp.mean(g, axis=-1, keepdims=True)
                mean_sq = jnp.mean(g * g, axis=-1, keepdims=True)
                var = mean_sq - mean * mean
                gamma = gb_refs[2 * i][...].astype(jnp.float32)
                beta = gb_refs[2 * i + 1][...].astype(jnp.float32)
                h = (g - mean) * lax.rsqrt(var + _LN_EPS) * gamma + beta
        o_ref[...] = h.astype(o_ref.dtype)

    return kernel


# ---------------------------------------------------------------------------
# Tiling / VMEM planning
# ---------------------------------------------------------------------------
def _plan_batch(batch):
    """Pick (batch_tile, padded_batch, n_tiles).

    Rules from the perf review:
      * never tile below 128 rows (tiny tiles starve the 256-wide MXU),
      * prefer 256/512-row tiles when the batch is large enough,
      * always emit >= 2 grid steps so both v7x TensorCores get work
        (the batch grid axis is marked "parallel").
    The batch is zero-padded up to n_tiles * tile; pad rows are sliced off
    after the kernel (GELU/LayerNorm of an all-zero row is finite, so no NaNs).
    """
    tb = 128
    for cand in (512, 256):
        if batch >= 2 * cand:
            tb = cand
            break
    n_tiles = max(2, pl.cdiv(batch, tb))
    return tb, n_tiles * tb, n_tiles


def _vmem_limit_bytes(tb, d_in, d_out, widths, weights, gammas, betas,
                      out_itemsize):
    """Generation-aware VMEM budget (v7x: 64 MiB physical, v5e/v6e: 128)."""
    resident = sum(int(w.size) * w.dtype.itemsize for w in weights)  # Buffered(1)
    resident += sum(int(a.size) * a.dtype.itemsize for a in (*gammas, *betas))
    io = 2 * tb * d_in * 2 + 2 * tb * d_out * out_itemsize   # double-buffered x / out
    act = tb * max(widths) * (4 + 2)                          # f32 act + bf16 cast copy
    need = resident + io + act

    try:
        cap = int(pltpu.get_tpu_info().vmem_capacity_bytes)
    except Exception:  # pragma: no cover - conservative fallback
        cap = 64 << 20
    hard_cap = (48 << 20) if cap <= (64 << 20) else (100 << 20)

    if need > hard_cap:
        # TODO(synk): implement the K/N-tiled path (grid over N with a fused
        # GELU epilogue, or a per-layer grid + f32 accumulator scratch with
        # pl.when init/finalize) before running transformer-FFN sized layers.
        raise NotImplementedError(
            f"fused MLP working set (~{need >> 20} MiB) exceeds the "
            f"{hard_cap >> 20} MiB VMEM budget; K/N tiling not implemented")
    return min(hard_cap, max(32 << 20, 2 * need))


# ---------------------------------------------------------------------------
# Wrapper: one fused pallas_call, batch-tiled "parallel" grid, resident weights
# ---------------------------------------------------------------------------
def mlp_forward(x, params, out_dtype=jnp.bfloat16):
    """Fused MLP forward. Dropout (p=0.2) is identity in eval mode."""
    # TODO(synk): training-mode dropout (pltpu.prng_seed / prng_random_bits)
    # is not implemented; eval-mode dropout is identity.
    weights = tuple(params["weights"])
    gammas = tuple(params["gammas"])
    betas = tuple(params["betas"])
    n_layers = len(weights)

    batch, d_in = x.shape
    d_out = weights[-1].shape[1]
    widths = [d_in] + [w.shape[1] for w in weights]

    # bf16 at the kernel boundary: the kernel feeds bf16 to every MXU dot
    # anyway, so f32 input/output DMA would be pure bandwidth waste.
    x = x.astype(jnp.bfloat16)

    tb, padded_batch, n_tiles = _plan_batch(batch)
    if padded_batch != batch:
        x = jnp.pad(x, ((0, padded_batch - batch), (0, 0)))

    out_itemsize = jax.dtypes.canonicalize_dtype(out_dtype).itemsize
    vmem_limit = _vmem_limit_bytes(tb, d_in, d_out, widths, weights, gammas,
                                   betas, out_itemsize)

    # x / out are tiled over the batch grid axis; weights / gamma / beta use
    # constant index maps + Buffered(1) so they are DMA'd once, stay
    # VMEM-resident across grid steps, and are NOT double-buffered.
    resident = dict(pipeline_mode=pl.Buffered(1))
    in_specs = [pl.BlockSpec((tb, d_in), lambda i: (i, 0))]
    gb_args = []
    for w in weights:
        in_specs.append(pl.BlockSpec(w.shape, lambda i: (0, 0), **resident))
    for g, b in zip(gammas, betas):
        in_specs.append(pl.BlockSpec(g.shape, lambda i: (0, 0), **resident))
        in_specs.append(pl.BlockSpec(b.shape, lambda i: (0, 0), **resident))
        gb_args.extend((g, b))

    out = pl.pallas_call(
        _make_fused_mlp_kernel(n_layers),
        out_shape=jax.ShapeDtypeStruct((padded_batch, d_out), out_dtype),
        grid=(n_tiles,),
        in_specs=in_specs,
        out_specs=pl.BlockSpec((tb, d_out), lambda i: (i, 0)),
        compiler_params=pltpu.CompilerParams(
            # Batch tiles are independent -> v7x's 2 TCs split the grid.
            dimension_semantics=("parallel",),
            vmem_limit_bytes=vmem_limit,
        ),
    )(x, *weights, *gb_args)

    return out[:batch] if padded_batch != batch else out


mlp_forward_jit = jax.jit(mlp_forward)


# ---------------------------------------------------------------------------
# Parameters (mimics PyTorch default bias-free Linear init; weights kept bf16)
# ---------------------------------------------------------------------------
def init_mlp_params(key, input_sizes, weight_dtype=jnp.bfloat16):
    params = {"weights": [], "gammas": [], "betas": []}
    n_layers = len(input_sizes) - 1
    keys = jax.random.split(key, n_layers)
    for i in range(1, len(input_sizes)):
        fan_in, fan_out = input_sizes[i - 1], input_sizes[i]
        bound = 1.0 / math.sqrt(fan_in)
        # Stored pre-transposed [in, out] so the kernel does a plain x @ W.
        w = jax.random.uniform(keys[i - 1], (fan_in, fan_out),
                               minval=-bound, maxval=bound, dtype=jnp.float32)
        params["weights"].append(w.astype(weight_dtype))
    if len(input_sizes) > 2:
        for i in range(1, len(input_sizes) - 1):
            h = input_sizes[i]
            params["gammas"].append(jnp.ones((1, h), jnp.float32))
            params["betas"].append(jnp.zeros((1, h), jnp.float32))
    return params


# Pure-JAX reference (same math, classic two-pass LayerNorm) for validation.
def mlp_reference(x, params):
    n_layers = len(params["weights"])
    h = x
    for i, w in enumerate(params["weights"]):
        h = jnp.dot(h.astype(w.dtype), w, preferred_element_type=jnp.float32)
        if i < n_layers - 1:
            h = 0.5 * h * (1.0 + lax.erf(h * _INV_SQRT2))
            mean = jnp.mean(h, axis=-1, keepdims=True)
            var = jnp.mean((h - mean) ** 2, axis=-1, keepdims=True)
            h = (h - mean) * lax.rsqrt(var + _LN_EPS)
            h = h * params["gammas"][i] + params["betas"][i]
    return h


# ---------------------------------------------------------------------------
# Main
# ---------------------------------------------------------------------------
if __name__ == "__main__":
    key = jax.random.PRNGKey(0)
    k_x, k_p = jax.random.split(key)

    # Small demo, but K/N aligned to the 256-wide MXU on v6e/v7x.
    input_sizes = [256, 512, 256]   # 2 Linear layers, GELU+LayerNorm between
    batch = 8                        # gets padded to 2 x 128-row tiles inside

    x = jax.random.normal(k_x, (batch, input_sizes[0]), dtype=jnp.float32)
    params = init_mlp_params(k_p, input_sizes)

    out = mlp_forward_jit(x, params)
    jax.block_until_ready(out)

    assert out.shape == (batch, input_sizes[-1])
    ref = mlp_reference(x, params)
    out_f32 = out.astype(jnp.float32)
    max_err = float(jnp.max(jnp.abs(out_f32 - ref)))
    assert jnp.allclose(out_f32, ref, atol=3e-2, rtol=3e-2), max_err
    print("KERNEL_OK")
</pallas_src>

<mosaic_0001>
module attributes {stable_mosaic.version = 11 : i64} {
  func.func @kernel(%arg0: i32, %arg1: memref<128x256xbf16, #tpu.memory_space<vmem>>, %arg2: memref<256x512xbf16, #tpu.memory_space<vmem>>, %arg3: memref<512x256xbf16, #tpu.memory_space<vmem>>, %arg4: memref<1x512xf32, #tpu.memory_space<vmem>>, %arg5: memref<1x512xf32, #tpu.memory_space<vmem>>, %arg6: memref<128x256xbf16, #tpu.memory_space<vmem>>) attributes {dimension_semantics = [#tpu.dimension_semantics<parallel>], iteration_bounds = array<i64: 2>, scalar_prefetch = 0 : i64, scratch_operands = 0 : i64, tpu.core_type = #tpu.core_type<tc>, window_params = [{transform_indices = @transform_0, window_bounds = array<i64: 128, 256>}, {pipeline_mode = #tpu.pipeline_mode<synchronous>, transform_indices = @transform_1, window_bounds = array<i64: 256, 512>}, {pipeline_mode = #tpu.pipeline_mode<synchronous>, transform_indices = @transform_2, window_bounds = array<i64: 512, 256>}, {pipeline_mode = #tpu.pipeline_mode<synchronous>, transform_indices = @transform_3, window_bounds = array<i64: 1, 512>}, {pipeline_mode = #tpu.pipeline_mode<synchronous>, transform_indices = @transform_4, window_bounds = array<i64: 1, 512>}, {transform_indices = @transform_5, window_bounds = array<i64: 128, 256>}]} {
    %c0 = arith.constant 0 : index
    %c0_0 = arith.constant 0 : index
    %0 = vector.load %arg1[%c0, %c0_0] : memref<128x256xbf16, #tpu.memory_space<vmem>>, vector<128x256xbf16>
    %c0_1 = arith.constant 0 : index
    %c0_2 = arith.constant 0 : index
    %1 = vector.load %arg2[%c0_1, %c0_2] : memref<256x512xbf16, #tpu.memory_space<vmem>>, vector<256x512xbf16>
    %cst = arith.constant dense<0.000000e+00> : vector<128x512xf32>
    %2 = tpu.matmul %0, %1, %cst {dimension_numbers = #tpu.dot_dimension_numbers<[1], [0], [0], [1], [0, 0, 1, 1], [], []>} : vector<128x256xbf16>, vector<256x512xbf16>, vector<128x512xf32> -> vector<128x512xf32>
    %cst_3 = arith.constant 5.000000e-01 : f32
    %3 = vector.broadcast %cst_3 : f32 to vector<128x512xf32>
    %4 = arith.mulf %3, %2 : vector<128x512xf32>
    %cst_4 = arith.constant 0.707106769 : f32
    %5 = vector.broadcast %cst_4 : f32 to vector<128x512xf32>
    %6 = arith.mulf %2, %5 : vector<128x512xf32>
    %7 = math.erf %6 : vector<128x512xf32>
    %cst_5 = arith.constant 1.000000e+00 : f32
    %8 = vector.broadcast %cst_5 : f32 to vector<128x512xf32>
    %9 = arith.addf %8, %7 : vector<128x512xf32>
    %10 = arith.mulf %4, %9 : vector<128x512xf32>
    %cst_6 = arith.constant dense<0.000000e+00> : vector<128xf32>
    %11 = vector.multi_reduction <add>, %10, %cst_6 [1] : vector<128x512xf32> to vector<128xf32>
    %12 = vector.shape_cast %11 : vector<128xf32> to vector<128x1xf32>
    %cst_7 = arith.constant 5.120000e+02 : f32
    %13 = vector.broadcast %cst_7 : f32 to vector<128x1xf32>
    %14 = arith.divf %12, %13 : vector<128x1xf32>
    %15 = arith.mulf %10, %10 : vector<128x512xf32>
    %cst_8 = arith.constant dense<0.000000e+00> : vector<128xf32>
    %16 = vector.multi_reduction <add>, %15, %cst_8 [1] : vector<128x512xf32> to vector<128xf32>
    %17 = vector.shape_cast %16 : vector<128xf32> to vector<128x1xf32>
    %cst_9 = arith.constant 5.120000e+02 : f32
    %18 = vector.broadcast %cst_9 : f32 to vector<128x1xf32>
    %19 = arith.divf %17, %18 : vector<128x1xf32>
    %20 = arith.mulf %14, %14 : vector<128x1xf32>
    %21 = arith.subf %19, %20 : vector<128x1xf32>
    %c0_10 = arith.constant 0 : index
    %c0_11 = arith.constant 0 : index
    %22 = vector.load %arg4[%c0_10, %c0_11] : memref<1x512xf32, #tpu.memory_space<vmem>>, vector<1x512xf32>
    %c0_12 = arith.constant 0 : index
    %c0_13 = arith.constant 0 : index
    %23 = vector.load %arg5[%c0_12, %c0_13] : memref<1x512xf32, #tpu.memory_space<vmem>>, vector<1x512xf32>
    %24 = vector.broadcast %14 : vector<128x1xf32> to vector<128x512xf32>
    %25 = arith.subf %10, %24 : vector<128x512xf32>
    %cst_14 = arith.constant 9.99999974E-6 : f32
    %26 = vector.broadcast %cst_14 : f32 to vector<128x1xf32>
    %27 = arith.addf %21, %26 : vector<128x1xf32>
    %28 = math.rsqrt %27 : vector<128x1xf32>
    %29 = vector.broadcast %28 : vector<128x1xf32> to vector<128x512xf32>
    %30 = arith.mulf %25, %29 : vector<128x512xf32>
    %31 = vector.broadcast %22 : vector<1x512xf32> to vector<128x512xf32>
    %32 = arith.mulf %30, %31 : vector<128x512xf32>
    %33 = vector.broadcast %23 : vector<1x512xf32> to vector<128x512xf32>
    %34 = arith.addf %32, %33 : vector<128x512xf32>
    %c0_15 = arith.constant 0 : index
    %c0_16 = arith.constant 0 : index
    %35 = vector.load %arg3[%c0_15, %c0_16] : memref<512x256xbf16, #tpu.memory_space<vmem>>, vector<512x256xbf16>
    %36 = arith.truncf %34 : vector<128x512xf32> to vector<128x512xbf16>
    %cst_17 = arith.constant dense<0.000000e+00> : vector<128x256xf32>
    %37 = tpu.matmul %36, %35, %cst_17 {dimension_numbers = #tpu.dot_dimension_numbers<[1], [0], [0], [1], [0, 0, 1, 1], [], []>} : vector<128x512xbf16>, vector<512x256xbf16>, vector<128x256xf32> -> vector<128x256xf32>
    %38 = arith.truncf %37 : vector<128x256xf32> to vector<128x256xbf16>
    %c0_18 = arith.constant 0 : index
    %c0_19 = arith.constant 0 : index
    %39 = vector.load %arg6[%c0_18, %c0_19] : memref<128x256xbf16, #tpu.memory_space<vmem>>, vector<128x256xbf16>
    tpu.vector_store %arg6[%c0_18, %c0_19], %38 {strides = array<i32>} : memref<128x256xbf16, #tpu.memory_space<vmem>>, vector<128x256xbf16>,
    return
  }
  func.func @transform_0(%arg0: i32) -> (i32, i32) {
    %c0_i32 = arith.constant 0 : i32
    %c0_i32_0 = arith.constant 0 : i32
    return %arg0, %c0_i32 : i32, i32
  }
  func.func @transform_1(%arg0: i32) -> (i32, i32) {
    %c0_i32 = arith.constant 0 : i32
    %c0_i32_0 = arith.constant 0 : i32
    %c0_i32_1 = arith.constant 0 : i32
    return %c0_i32, %c0_i32_0 : i32, i32
  }
  func.func @transform_2(%arg0: i32) -> (i32, i32) {
    %c0_i32 = arith.constant 0 : i32
    %c0_i32_0 = arith.constant 0 : i32
    %c0_i32_1 = arith.constant 0 : i32
    return %c0_i32, %c0_i32_0 : i32, i32
  }
  func.func @transform_3(%arg0: i32) -> (i32, i32) {
    %c0_i32 = arith.constant 0 : i32
    %c0_i32_0 = arith.constant 0 : i32
    %c0_i32_1 = arith.constant 0 : i32
    return %c0_i32, %c0_i32_0 : i32, i32
  }
  func.func @transform_4(%arg0: i32) -> (i32, i32) {
    %c0_i32 = arith.constant 0 : i32
    %c0_i32_0 = arith.constant 0 : i32
    %c0_i32_1 = arith.constant 0 : i32
    return %c0_i32, %c0_i32_0 : i32, i32
  }
  func.func @transform_5(%arg0: i32) -> (i32, i32) {
    %c0_i32 = arith.constant 0 : i32
    %c0_i32_0 = arith.constant 0 : i32
    return %arg0, %c0_i32 : i32, i32
  }
}

</mosaic_0001>

<bundles_post_ra>
// kernel: mlp_forward.1
= control target key start
LH: loop header
LB: loop body
LE: loop exit
PB: predicated region body
PF: predicated region fallthrough
CT: control target
= control target key end

     0   :  { %10 = vsyncpa [#allocation3], 0  ;;  %s4893_s0 = inlined_call_operand.vmem [shape: bf16[256,256], index: 0, kind: input, shape index: {}]   ;;  %s4894_s1 = inlined_call_operand.hbm [shape: bf16[256,512], index: 1, kind: input, shape index: {}]   ;;  %s4895_s2 = inlined_call_operand.hbm [shape: bf16[512,256], index: 2, kind: input, shape index: {}]   ;;  %s4896_s3 = inlined_call_operand.vmem [shape: f32[1,512], index: 3, kind: input, shape index: {}]   ;;  %s4897_s4 = inlined_call_operand.vmem [shape: f32[1,512], index: 4, kind: input, shape index: {}]   ;;  %s4898_s5 = inlined_call_operand.vmem [shape: bf16[256,256], index: 5, kind: output, shape index: {}]  }
   0x1   :  { %11 = vsyncpa [#allocation5], 0  ;;  %s3488_s18 = smov 0  }
   0x2 LB: > { %s3452_s19 = smov [#allocation2]   ;;  %s2744_s21 = sadd.s32 4294967295, %s3450_s18   ;;  %s3450_s18 = sphi %s3488_s18, %s17_s18  }
   0x3   : > { %s170_s20 = sshll.u32 %s3452_s19, 4  ;;  %p2746_p0 = scmp.ge.s32.totalorder %s3450_s18, 1  ;;  %s171_s20 = int_to_ptr.vmem [resolvable:$true] %s170_s20 }
   0x4   : > { %p158_p1 = scmp.lt.s32.totalorder %s3450_s18, 3  ;;  %p3502_p3 = scmp.eq.s32.totalorder %s2744_s21, 0 }
   0x5   : > { %s3453_s24 = smov [#allocation4]   ;;  %s3380_s29 = scalar_lea.hbm %s4894_s1, 8192 }
   0x6   : > { %p3496_p2 = pnand %p2746_p0, %p158_p1  ;;  %s183_s25 = sshll.u32 %s3453_s24, 4  ;;  %s3514_s25 = int_to_ptr.vmem [resolvable:$true] %s183_s25 }
   0x7   : > { %s4994_s23 = scalar_select %p3502_p3, 1, 0 }
   0x8   : > { %s4993_s22 = scalar_select %p3496_p2, 1, 0 }
   0x9   : > { %p2979_p4 = pneg %p3496_p2  ;;  %p3381_p6 = scmp.ne.s32.totalorder %s4894_s1, %s3380_s29 }
   0xa   : > { %p3387_p10 = scmp.lt.u32.totalorder %s3380_s29, %s4894_s1 }
   0xb   : > { %p3510_p5 = pnand %p3502_p3, %p2979_p4 }
   0xd   : > { %p3382_p7 = pneg %p3510_p5 }
   0xf   : > { %p3383_p8 = pnand %p3382_p7, %p3381_p6 }
  0x11   : > { %p3384_p9 = pneg %p3383_p8 }
  0x13   : > { %p3389_p11 = pnand %p3387_p10, %p3384_p9 }
  0x15   : > { %3392 = shalt.err (!%p3389_p11)
}
  0x16   : > { %s3393_s9 = scalar_lea.vmem %s171_s20, 8192  ;;  %p3401_p1 = scmp.lt.s32.totalorder %s171_s20, %s171_s20 }
  0x17   : > { %p3394_p12 = scmp.ne.s32.totalorder %s171_s20, %s3393_s9  ;;  %p3402_p4 = scmp.lt.s32.totalorder %s3393_s9, %s3393_s9 }
  0x19   : > { %p3396_p13 = pnand %p3394_p12, %p3382_p7  ;;  %p3403_p3 = por %p3402_p4, %p3401_p1 }
  0x1b   : > { %p3397_p0 = pneg %p3396_p13 }
  0x1d   : > { %p3404_p2 = pnand %p3403_p3, %p3397_p0 }
  0x1f   : > { %3407 = shalt.err (!%p3404_p2)
}
  0x20   : > { %s3454_s10 = smov 256   ;;  %s3455_s11 = smov 16  }
  0x21   : > { %2982 = dma.hbm_to_vmem [thread:$0]  (!%p3510_p5), %s4894_s1, 8192, %s171_s20, [#allocation3], %s3454_s10, %s3454_s10, %s3455_s11  }
  0x22   : > { %s3408_s16 = scalar_lea.hbm %s4895_s2, 8192 }
  0x23   : > { %p3409_p6 = scmp.ne.s32.totalorder %s4895_s2, %s3408_s16  ;;  %p3415_p8 = scmp.lt.u32.totalorder %s3408_s16, %s4895_s2 }
  0x25   : > { %p3411_p2 = pnand %p3409_p6, %p3382_p7 }
  0x27   : > { %p3412_p3 = pneg %p3411_p2 }
  0x29   : > { %p3417_p9 = pnand %p3415_p8, %p3412_p3 }
  0x2b   : > { %3420 = shalt.err (!%p3417_p9)
}
  0x2c   : > { %s3421_s20 = scalar_lea.vmem %s3514_s25, 8192  ;;  %p3429_p13 = scmp.lt.s32.totalorder %s3514_s25, %s3514_s25 }
  0x2d   : > { %p3422_p10 = scmp.ne.s32.totalorder %s3514_s25, %s3421_s20  ;;  %p3430_p0 = scmp.lt.s32.totalorder %s3421_s20, %s3421_s20 }
  0x2f   : > { %p3424_p11 = pnand %p3422_p10, %p3382_p7  ;;  %p3431_p1 = por %p3430_p0, %p3429_p13 }
  0x31   : > { %p3425_p12 = pneg %p3424_p11 }
  0x33   : > { %p3432_p4 = pnand %p3431_p1, %p3425_p12 }
  0x35   : > { %3435 = shalt.err (!%p3432_p4)
}
  0x36   : > { %s3456_s28 = smov 128   ;;  %s3457_s29 = smov 8  }
  0x37   : > { %2985 = dma.hbm_to_vmem [thread:$0]  (!%p3510_p5), %s4895_s2, 8192, %s3514_s25, [#allocation5], %s3456_s28, %s3456_s28, %s3457_s29  }
  0x38   : > { %p4996_p6 = scmp.ne.s32.totalorder %s4993_s22, 0 }
  0x3a   : > { %215 = sbr.rel (%p4996_p6) target bundleno = 953 (0x3b9), region = 40 }
  0x41   : > { %p4997_p7 = scmp.ne.s32.totalorder %s4994_s23, 0 }
  0x43   : > { %3441 = dma.done.wait (%p4997_p7), [#allocation3], 8192  }
  0x44   : > { %3443 = vsyncadd (%p4997_p7), [#allocation3], 4294959104 }
  0x45   : > { %3445 = dma.done.wait (%p4997_p7), [#allocation5], 8192  }
  0x46   : > { %3447 = vsyncadd (%p4997_p7), [#allocation5], 4294959104  ;;  %v3004_v0 = vld [vmem:[#allocation2 + $0x4] ss:$16 sps:$4 sm:$0xff]   ;;  %v3006_v1 = vld [vmem:[#allocation2] ss:$16 sps:$4 sm:$0xff]  }
  0x47   : > { %743 = vmatprep.subr.bf16.mxu1 %v3004_v0  ;;  %v3007_v2 = vld [vmem:[#allocation2 + $0x24] ss:$16 sps:$4 sm:$0xff]   ;;  %v3009_v3 = vld [vmem:[#allocation2 + $0x20] ss:$16 sps:$4 sm:$0xff]   ;;  %s2753_s22 = sshll.u32 %s2744_s21, 4 }
  0x48   : > { %744 = vmatpush1.bf16.msra.mxu1 %v3006_v1  ;;  %v3010_v4 = vld [vmem:[#allocation2 + $0x44] ss:$16 sps:$4 sm:$0xff]   ;;  %v3012_v5 = vld [vmem:[#allocation2 + $0x40] ss:$16 sps:$4 sm:$0xff]   ;;  %p250_p5 = scmp.lt.s32.totalorder %s2753_s22, 31 }
  0x49   : > { %745 = vmatprep.subr.bf16.mxu1 %v3007_v2  ;;  %v3013_v6 = vld [vmem:[#allocation2 + $0x64] ss:$16 sps:$4 sm:$0xff]   ;;  %v3015_v7 = vld [vmem:[#allocation2 + $0x60] ss:$16 sps:$4 sm:$0xff]   ;;  %v3057_v33 = vld [vmem:[#allocation2 + $0xc] ss:$16 sps:$4 sm:$0xff]  }
  0x4a   : > { %v3016_v8 = vld [vmem:[#allocation2 + $0x84] ss:$16 sps:$4 sm:$0xff]   ;;  %s5154_s22 = smov (!%p250_p5, %s2753_s22), 31  ;;  %v3018_v9 = vld [vmem:[#allocation2 + $0x80] ss:$16 sps:$4 sm:$0xff]  }
  0x4b   : > { %v3019_v10 = vld [vmem:[#allocation2 + $0xa4] ss:$16 sps:$4 sm:$0xff]   ;;  %s2921_s23 = sshll.u32 %s5154_s22, 3  ;;  %v3021_v11 = vld [vmem:[#allocation2 + $0xa0] ss:$16 sps:$4 sm:$0xff]  }
  0x4c   : > { %746 = vmatpush1.bf16.msra.mxu1 %v3009_v3  ;;  %s3583_s26 = scalar_lea.vmem %s4893_s0, %s2921_s23  ;;  %v3022_v12 = vld [vmem:[#allocation2 + $0xc4] ss:$16 sps:$4 sm:$0xff]   ;;  %v3024_v14 = vld [vmem:[#allocation2 + $0xc0] ss:$16 sps:$4 sm:$0xff]   ;;  %v3055_v35 = vld [vmem:[#allocation2 + $0x8] ss:$16 sps:$4 sm:$0xff]   ;;  %s4872_s13 = scalar_lea.vmem %s4898_s5, %s2921_s23 }
  0x4d   : > { %747 = vmatprep.subr.bf16.mxu1 %v3010_v4  ;;  %v3586_v13 = vld [vmem:[%s3583_s26 + $0x4] ss:$8 sps:$4 sm:$0xff]   ;;  %v3027_v16 = vld [vmem:[#allocation2 + $0xe0] ss:$16 sps:$4 sm:$0xff]   ;;  %v3593_v36 = vld [vmem:[%s3583_s26 + $0x14] ss:$8 sps:$4 sm:$0xff]  }
  0x4e   : > { %v3025_v15 = vld [vmem:[#allocation2 + $0xe4] ss:$16 sps:$4 sm:$0xff]   ;;  %775 = vmatprep.mubr.bf16.mxu1 %v3586_v13  ;;  %v3030_v18 = vld [vmem:[#allocation2 + $0x100] ss:$16 sps:$4 sm:$0xff]   ;;  %v3060_v37 = vld [vmem:[#allocation2 + $0x2c] ss:$16 sps:$4 sm:$0xff]  }
  0x4f   : > { %v3028_v17 = vld [vmem:[#allocation2 + $0x104] ss:$16 sps:$4 sm:$0xff]   ;;  %v3033_v20 = vld [vmem:[#allocation2 + $0x120] ss:$16 sps:$4 sm:$0xff]   ;;  %v3058_v38 = vld [vmem:[#allocation2 + $0x28] ss:$16 sps:$4 sm:$0xff]  }
  0x50   : > { %748 = vmatpush1.bf16.msra.mxu1 %v3012_v5  ;;  %v3031_v19 = vld [vmem:[#allocation2 + $0x124] ss:$16 sps:$4 sm:$0xff]   ;;  %v3036_v22 = vld [vmem:[#allocation2 + $0x140] ss:$16 sps:$4 sm:$0xff]   ;;  %v3066_v39 = vld [vmem:[#allocation2 + $0x4c] ss:$16 sps:$4 sm:$0xff]  }
  0x51   : > { %749 = vmatprep.subr.bf16.mxu1 %v3013_v6  ;;  %v3034_v21 = vld [vmem:[#allocation2 + $0x144] ss:$16 sps:$4 sm:$0xff]   ;;  %v3039_v24 = vld [vmem:[#allocation2 + $0x160] ss:$16 sps:$4 sm:$0xff]   ;;  %v3064_v41 = vld [vmem:[#allocation2 + $0x48] ss:$16 sps:$4 sm:$0xff]  }
  0x52   : > { %v3037_v23 = vld [vmem:[#allocation2 + $0x164] ss:$16 sps:$4 sm:$0xff]   ;;  %v3042_v26 = vld [vmem:[#allocation2 + $0x180] ss:$16 sps:$4 sm:$0xff]   ;;  %v3069_v43 = vld [vmem:[#allocation2 + $0x6c] ss:$16 sps:$4 sm:$0xff]  }
  0x53   : > { %v3040_v25 = vld [vmem:[#allocation2 + $0x184] ss:$16 sps:$4 sm:$0xff]   ;;  %v3045_v28 = vld [vmem:[#allocation2 + $0x1a0] ss:$16 sps:$4 sm:$0xff]   ;;  %v3067_v44 = vld [vmem:[#allocation2 + $0x68] ss:$16 sps:$4 sm:$0xff]  }
  0x54   : > { %750 = vmatpush1.bf16.msra.mxu1 %v3015_v7  ;;  %v3043_v27 = vld [vmem:[#allocation2 + $0x1a4] ss:$16 sps:$4 sm:$0xff]   ;;  %v3048_v30 = vld [vmem:[#allocation2 + $0x1c0] ss:$16 sps:$4 sm:$0xff]   ;;  %v3075_v45 = vld [vmem:[#allocation2 + $0x8c] ss:$16 sps:$4 sm:$0xff]  }
  0x55   : > { %751 = vmatprep.subr.bf16.mxu1 %v3016_v8  ;;  %v3046_v29 = vld [vmem:[#allocation2 + $0x1c4] ss:$16 sps:$4 sm:$0xff]   ;;  %v3051_v32 = vld [vmem:[#allocation2 + $0x1e0] ss:$16 sps:$4 sm:$0xff]   ;;  %v3073_v47 = vld [vmem:[#allocation2 + $0x88] ss:$16 sps:$4 sm:$0xff]  }
  0x56   : > { %v3049_v31 = vld [vmem:[#allocation2 + $0x1e4] ss:$16 sps:$4 sm:$0xff]   ;;  %v3590_v34 = vld [vmem:[%s3583_s26] ss:$8 sps:$4 sm:$0xff]   ;;  %v3598_v40 = vld [vmem:[%s3583_s26 + $0x10] ss:$8 sps:$4 sm:$0xff]  }
  0x57   : > { %v3601_v42 = vld [vmem:[%s3583_s26 + $0x24] ss:$8 sps:$4 sm:$0xff]   ;;  %v3606_v46 = vld [vmem:[%s3583_s26 + $0x20] ss:$8 sps:$4 sm:$0xff]   ;;  %v3609_v48 = vld [vmem:[%s3583_s26 + $0x34] ss:$8 sps:$4 sm:$0xff]  }
  0x58   : > { %752 = vmatpush1.bf16.msra.mxu1 %v3018_v9  ;;  %v3078_v49 = vld [vmem:[#allocation2 + $0xac] ss:$16 sps:$4 sm:$0xff]   ;;  %v3076_v50 = vld [vmem:[#allocation2 + $0xa8] ss:$16 sps:$4 sm:$0xff]  }
  0x59   : > { %753 = vmatprep.subr.bf16.mxu1 %v3019_v10  ;;  %v3084_v51 = vld [vmem:[#allocation2 + $0xcc] ss:$16 sps:$4 sm:$0xff]   ;;  %v3614_v52 = vld [vmem:[%s3583_s26 + $0x30] ss:$8 sps:$4 sm:$0xff]   ;;  %v3090_v58 = vld [vmem:[%s3583_s26 + $0x40] ss:$8 sps:$4 sm:$0xff]  }
  0x5a   : > { %v3082_v53 = vld [vmem:[#allocation2 + $0xc8] ss:$16 sps:$4 sm:$0xff]   ;;  %v3088_v54 = vld [vmem:[%s3583_s26 + $0x44] ss:$8 sps:$4 sm:$0xff]   ;;  %v3097_v60 = vld [vmem:[%s3583_s26 + $0x54] ss:$8 sps:$4 sm:$0xff]  }
  0x5b   : > { %v3087_v55 = vld [vmem:[#allocation2 + $0xec] ss:$16 sps:$4 sm:$0xff]   ;;  %v3085_v56 = vld [vmem:[#allocation2 + $0xe8] ss:$16 sps:$4 sm:$0xff]  }
  0x5c   : > { %754 = vmatpush1.bf16.msra.mxu1 %v3021_v11  ;;  %v3093_v57 = vld [vmem:[#allocation2 + $0x10c] ss:$16 sps:$4 sm:$0xff]   ;;  %v3091_v59 = vld [vmem:[#allocation2 + $0x108] ss:$16 sps:$4 sm:$0xff]  }
  0x5d   : > { %755 = vmatprep.subr.bf16.mxu1 %v3022_v12  ;;  %v3096_v61 = vld [vmem:[#allocation2 + $0x12c] ss:$16 sps:$4 sm:$0xff]   ;;  %v3094_v62 = vld [vmem:[#allocation2 + $0x128] ss:$16 sps:$4 sm:$0xff]  }
  0x5e   : > { %v3102_v63 = vld [vmem:[#allocation2 + $0x14c] ss:$16 sps:$4 sm:$0xff]   ;;  %v3099_v0 = vld [vmem:[%s3583_s26 + $0x50] ss:$8 sps:$4 sm:$0xff]   ;;  %v3108_v6 = vld [vmem:[%s3583_s26 + $0x60] ss:$8 sps:$4 sm:$0xff]  }
  0x5f   : > { %v3100_v1 = vld [vmem:[#allocation2 + $0x148] ss:$16 sps:$4 sm:$0xff]   ;;  %v3106_v2 = vld [vmem:[%s3583_s26 + $0x64] ss:$8 sps:$4 sm:$0xff]   ;;  %v3115_v8 = vld [vmem:[%s3583_s26 + $0x74] ss:$8 sps:$4 sm:$0xff]  }
  0x60   : > { %756 = vmatpush1.bf16.msra.mxu1 %v3024_v14  ;;  %v3105_v3 = vld [vmem:[#allocation2 + $0x16c] ss:$16 sps:$4 sm:$0xff]   ;;  %v3103_v4 = vld [vmem:[#allocation2 + $0x168] ss:$16 sps:$4 sm:$0xff]  }
  0x61   : > { %757 = vmatprep.subr.bf16.mxu1 %v3025_v15  ;;  %v3111_v5 = vld [vmem:[#allocation2 + $0x18c] ss:$16 sps:$4 sm:$0xff]   ;;  %v3109_v7 = vld [vmem:[#allocation2 + $0x188] ss:$16 sps:$4 sm:$0xff]  }
  0x62   : > { %v3114_v9 = vld [vmem:[#allocation2 + $0x1ac] ss:$16 sps:$4 sm:$0xff]   ;;  %v3112_v10 = vld [vmem:[#allocation2 + $0x1a8] ss:$16 sps:$4 sm:$0xff]  }
  0x63   : > { %v3120_v11 = vld [vmem:[#allocation2 + $0x1cc] ss:$16 sps:$4 sm:$0xff]   ;;  %v3117_v12 = vld [vmem:[%s3583_s26 + $0x70] ss:$8 sps:$4 sm:$0xff]  }
  0x64   : > { %758 = vmatpush1.bf16.msra.mxu1 %v3027_v16  ;;  %v3118_v14 = vld [vmem:[#allocation2 + $0x1c8] ss:$16 sps:$4 sm:$0xff]   ;;  %v3123_v15 = vld [vmem:[#allocation2 + $0x1ec] ss:$16 sps:$4 sm:$0xff]  }
  0x65   : > { %759 = vmatprep.subr.bf16.mxu1 %v3028_v17  ;;  %v3121_v16 = vld [vmem:[#allocation2 + $0x1e8] ss:$16 sps:$4 sm:$0xff]  }
  0x68   : > { %760 = vmatpush1.bf16.msra.mxu1 %v3030_v18 }
  0x69   : > { %761 = vmatprep.subr.bf16.mxu1 %v3031_v19 }
  0x6c   : > { %762 = vmatpush1.bf16.msra.mxu1 %v3033_v20 }
  0x6d   : > { %763 = vmatprep.subr.bf16.mxu1 %v3034_v21 }
  0x70   : > { %764 = vmatpush1.bf16.msra.mxu1 %v3036_v22 }
  0x71   : > { %765 = vmatprep.subr.bf16.mxu1 %v3037_v23 }
  0x74   : > { %766 = vmatpush1.bf16.msra.mxu1 %v3039_v24 }
  0x75   : > { %767 = vmatprep.subr.bf16.mxu1 %v3040_v25 }
  0x78   : > { %768 = vmatpush1.bf16.msra.mxu1 %v3042_v26 }
  0x79   : > { %769 = vmatprep.subr.bf16.mxu1 %v3043_v27 }
  0x7c   : > { %770 = vmatpush1.bf16.msra.mxu1 %v3045_v28 }
  0x7d   : > { %771 = vmatprep.subr.bf16.mxu1 %v3046_v29 }
  0x80   : > { %772 = vmatpush1.bf16.msra.mxu1 %v3048_v30 }
  0x81   : > { %773 = vmatprep.subr.bf16.mxu1 %v3049_v31 }
  0x84   : > { %774 = vmatpush1.bf16.msra.mxu1 %v3051_v32 }
  0x85   : > { %856 = vmatprep.subr.bf16.mxu1 %v3057_v33 }
  0x87   : > { %776 = vmatmul.mubr.bf16.vlgmr.msra.gmra.mrb[0].mxu1 %v3590_v34 }
  0x88   : > { %857 = vmatpush1.bf16.msra.mxu1 %v3055_v35  ;;  %785 = vmatprep.mubr.bf16.mxu1 %v3593_v36 }
  0x89   : > { %858 = vmatprep.subr.bf16.mxu1 %v3060_v37 }
  0x8c   : > { %859 = vmatpush1.bf16.msra.mxu1 %v3058_v38 }
  0x8d   : > { %860 = vmatprep.subr.bf16.mxu1 %v3066_v39 }
  0x8f   : > { %786 = vmatmul.mubr.bf16.gmra.mrb[4].mxu1 %v3598_v40 }
  0x90   : > { %861 = vmatpush1.bf16.msra.mxu1 %v3064_v41  ;;  %795 = vmatprep.mubr.bf16.mxu1 %v3601_v42 }
  0x91   : > { %862 = vmatprep.subr.bf16.mxu1 %v3069_v43 }
  0x94   : > { %863 = vmatpush1.bf16.msra.mxu1 %v3067_v44 }
  0x95   : > { %864 = vmatprep.subr.bf16.mxu1 %v3075_v45 }
  0x97   : > { %796 = vmatmul.mubr.bf16.gmra.mrb[8].mxu1 %v3606_v46 }
  0x98   : > { %865 = vmatpush1.bf16.msra.mxu1 %v3073_v47  ;;  %805 = vmatprep.mubr.bf16.mxu1 %v3609_v48 }
  0x99   : > { %866 = vmatprep.subr.bf16.mxu1 %v3078_v49 }
  0x9c   : > { %867 = vmatpush1.bf16.msra.mxu1 %v3076_v50 }
  0x9d   : > { %868 = vmatprep.subr.bf16.mxu1 %v3084_v51 }
  0x9f   : > { %806 = vmatmul.mubr.bf16.gmra.mrb[12].mxu1 %v3614_v52 }
  0xa0   : > { %869 = vmatpush1.bf16.msra.mxu1 %v3082_v53  ;;  %815 = vmatprep.mubr.bf16.mxu1 %v3088_v54 }
  0xa1   : > { %870 = vmatprep.subr.bf16.mxu1 %v3087_v55 }
  0xa4   : > { %871 = vmatpush1.bf16.msra.mxu1 %v3085_v56  ;;  %v3127_v56 = vld [vmem:[#allocation4 + $0x14] ss:$8 sps:$4 sm:$0xff]  }
  0xa5   : > { %872 = vmatprep.subr.bf16.mxu1 %v3093_v57 }
  0xa7   : > { %816 = vmatmul.mubr.bf16.gmra.mrb[16].mxu1 %v3090_v58 }
  0xa8   : > { %873 = vmatpush1.bf16.msra.mxu1 %v3091_v59  ;;  %825 = vmatprep.mubr.bf16.mxu1 %v3097_v60 }
  0xa9   : > { %874 = vmatprep.subr.bf16.mxu1 %v3096_v61 }
  0xac   : > { %875 = vmatpush1.bf16.msra.mxu1 %v3094_v62 }
  0xad   : > { %876 = vmatprep.subr.bf16.mxu1 %v3102_v63 }
  0xaf   : > { %826 = vmatmul.mubr.bf16.gmra.mrb[20].mxu1 %v3099_v0 }
  0xb0   : > { %877 = vmatpush1.bf16.msra.mxu1 %v3100_v1  ;;  %835 = vmatprep.mubr.bf16.mxu1 %v3106_v2  ;;  %v3130_v1 = vld [vmem:[#allocation4 + $0x24] ss:$8 sps:$4 sm:$0xff]  }
  0xb1   : > { %878 = vmatprep.subr.bf16.mxu1 %v3105_v3 }
  0xb4   : > { %879 = vmatpush1.bf16.msra.mxu1 %v3103_v4 }
  0xb5   : > { %880 = vmatprep.subr.bf16.mxu1 %v3111_v5 }
  0xb7   : > { %836 = vmatmul.mubr.bf16.gmra.mrb[24].mxu1 %v3108_v6 }
  0xb8   : > { %881 = vmatpush1.bf16.msra.mxu1 %v3109_v7  ;;  %845 = vmatprep.mubr.bf16.mxu1 %v3115_v8 }
  0xb9   : > { %882 = vmatprep.subr.bf16.mxu1 %v3114_v9 }
  0xbc   : > { %883 = vmatpush1.bf16.msra.mxu1 %v3112_v10 }
  0xbd   : > { %884 = vmatprep.subr.bf16.mxu1 %v3120_v11 }
  0xbf   : > { %846 = vmatmul.mubr.bf16.gmra.mrb[28].mxu1 %v3117_v12 }
  0xc0   : > { %885 = vmatpush1.bf16.msra.mxu1 %v3118_v14  ;;  %888 = vmatprep.mubr.bf16.mxu1 %v3586_v13 }
  0xc1   : > { %886 = vmatprep.subr.bf16.mxu1 %v3123_v15 }
  0xc4   : > { %887 = vmatpush1.bf16.msra.mxu1 %v3121_v16  ;;  %v3132_v16 = vld [vmem:[#allocation4 + $0x20] ss:$8 sps:$4 sm:$0xff]  }
  0xc7   : > { %889 = vmatmul.mubr.bf16.vlgmr.msra.gmra.mrb[32].mxu1 %v3590_v34 }
  0xc8   : > { %898 = vmatprep.mubr.bf16.mxu1 %v3593_v36 }
  0xcf   : > { %899 = vmatmul.mubr.bf16.gmra.mrb[36].mxu1 %v3598_v40 }
  0xd0   : > { %908 = vmatprep.mubr.bf16.mxu1 %v3601_v42 }
  0xd7   : > { %909 = vmatmul.mubr.bf16.gmra.mrb[40].mxu1 %v3606_v46 }
  0xd8   : > { %918 = vmatprep.mubr.bf16.mxu1 %v3609_v48  ;;  %v3124_v48 = vld [vmem:[#allocation4 + $0x4] ss:$8 sps:$4 sm:$0xff]  }
  0xd9   : > { %2326 = vmatprep.subr.bf16.mxu0 %v3124_v48 }
  0xdf   : > { %919 = vmatmul.mubr.bf16.gmra.mrb[44].mxu1 %v3614_v52  ;;  %v3126_v52 = vld [vmem:[#allocation4] ss:$8 sps:$4 sm:$0xff]  }
  0xe0   : > { %928 = vmatprep.mubr.bf16.mxu1 %v3088_v54  ;;  %2327 = vmatpush1.bf16.msra.mxu0 %v3126_v52 }
  0xe1   : > { %2328 = vmatprep.subr.bf16.mxu0 %v3127_v56 }
  0xe7   : > { %929 = vmatmul.mubr.bf16.gmra.mrb[48].mxu1 %v3090_v58 }
  0xe8   : > { %938 = vmatprep.mubr.bf16.mxu1 %v3097_v60  ;;  %v3129_v60 = vld [vmem:[#allocation4 + $0x10] ss:$8 sps:$4 sm:$0xff]  }
  0xe9   : > { %2329 = vmatpush1.bf16.msra.mxu0 %v3129_v60 }
  0xea   : > { %2330 = vmatprep.subr.bf16.mxu0 %v3130_v1  ;;  %v3139_v1 = vld [vmem:[#allocation4 + $0x54] ss:$8 sps:$4 sm:$0xff]  }
  0xed   : > { %2331 = vmatpush1.bf16.msra.mxu0 %v3132_v16 }
  0xef   : > { %939 = vmatmul.mubr.bf16.gmra.mrb[52].mxu1 %v3099_v0 }
  0xf0   : > { %948 = vmatprep.mubr.bf16.mxu1 %v3106_v2 }
  0xf7   : > { %949 = vmatmul.mubr.bf16.gmra.mrb[56].mxu1 %v3108_v6 }
  0xf8   : > { %958 = vmatprep.mubr.bf16.mxu1 %v3115_v8 }
  0xff   : > { %959 = vmatmul.mubr.bf16.gmra.mrb[60].mxu1 %v3117_v12 }
 0x15a   : > { %v777_v13 = vpop.f32.mrb[0].mxu1 }
 0x15b   : > { %v779_v17 = vpop.f32.mrb[1].mxu1  ;;  %v1033_v20 = vmul.f32 0.70710677, %v777_v13  ;;  %v969_v53 = vmul.f32 0.5, %v777_v13 }
 0x15c   : > { %v781_v18 = vpop.f32.mrb[2].mxu1  ;;  %v1034_v22 = vmul.f32 0.70710677, %v779_v17  ;;  %v970_v57 = vmul.f32 0.5, %v779_v17 }
 0x15d   : > { %v783_v19 = vpop.f32.mrb[3].mxu1  ;;  %v1037_v24 = vmul.f32 0.70710677, %v781_v18  ;;  %3220 = verf.f32 %v1033_v20  ;;  %v973_v58 = vmul.f32 0.5, %v781_v18  ;;  %v3133_v20 = vld [vmem:[#allocation4 + $0x34] ss:$8 sps:$4 sm:$0xff]  }
 0x15e   : > { %v1038_v26 = vmul.f32 0.70710677, %v783_v19  ;;  %3222 = verf.f32 %v1034_v22  ;;  %v974_v63 = vmul.f32 0.5, %v783_v19  ;;  %2332 = vmatprep.subr.bf16.mxu0 %v3133_v20 }
 0x15f   : > { %3224 = verf.f32 %v1037_v24 }
 0x160   : > { %3226 = verf.f32 %v1038_v26 }
 0x162   : > { %v3633_v21 = vpop.f32.mrb[4].mxu1 }
 0x163   : > { %v3635_v23 = vpop.f32.mrb[5].mxu1  ;;  %v1041_v28 = vmul.f32 0.70710677, %v3633_v21  ;;  %v977_v8 = vmul.f32 0.5, %v3633_v21 }
 0x164   : > { %v3637_v25 = vpop.f32.mrb[6].mxu1  ;;  %v1042_v30 = vmul.f32 0.70710677, %v3635_v23  ;;  %v978_v11 = vmul.f32 0.5, %v3635_v23 }
 0x165   : > { %v3639_v27 = vpop.f32.mrb[7].mxu1  ;;  %v1045_v32 = vmul.f32 0.70710677, %v3637_v25  ;;  %3228 = verf.f32 %v1041_v28  ;;  %v981_v12 = vmul.f32 0.5, %v3637_v25 }
 0x166   : > { %v1046_v34 = vmul.f32 0.70710677, %v3639_v27  ;;  %3230 = verf.f32 %v1042_v30  ;;  %v982_v14 = vmul.f32 0.5, %v3639_v27 }
 0x167   : > { %v3221_v36 = vpop.eup %3220  ;;  %3232 = verf.f32 %v1045_v32 }
 0x168   : > { %v3223_v37 = vpop.eup %3222  ;;  %3234 = verf.f32 %v1046_v34  ;;  %v1161_v42 = vadd.f32 1.0, %v3221_v36  ;;  %v3135_v34 = vld [vmem:[#allocation4 + $0x30] ss:$8 sps:$4 sm:$0xff]  }
 0x169   : > { %v3225_v38 = vpop.eup %3224  ;;  %v1162_v45 = vadd.f32 1.0, %v3223_v37  ;;  %2333 = vmatpush1.bf16.msra.mxu0 %v3135_v34 }
 0x16a   : > { %v3642_v29 = vpop.f32.mrb[8].mxu1  ;;  %v3227_v41 = vpop.eup %3226  ;;  %v1165_v49 = vadd.f32 1.0, %v3225_v38  ;;  %v3667_v62 = vmul.f32 %v1161_v42, %v969_v53 }
 0x16b   : > { %v3645_v31 = vpop.f32.mrb[9].mxu1  ;;  %v1049_v39 = vmul.f32 0.70710677, %v3642_v29  ;;  %v1166_v54 = vadd.f32 1.0, %v3227_v41  ;;  %v3670_v3 = vmul.f32 %v1162_v45, %v970_v57  ;;  %v3686_v17 = vmul.f32 0.5, %v3642_v29 }
 0x16c   : > { %v3648_v33 = vpop.f32.mrb[10].mxu1  ;;  %v1050_v43 = vmul.f32 0.70710677, %v3645_v31  ;;  %4998 = vst [vmem:[#allocation8_spill] sm:$0xff] %v3667_v62  ;;  %v3672_v4 = vmul.f32 %v1165_v49, %v973_v58  ;;  %v1386_v19 = vmul.f32 %v3667_v62, %v3667_v62  ;;  %v986_v29 = vmul.f32 0.5, %v3645_v31 }
 0x16d   : > { %v3651_v35 = vpop.f32.mrb[11].mxu1  ;;  %v1053_v46 = vmul.f32 0.70710677, %v3648_v33  ;;  %3236 = verf.f32 %v1049_v39  ;;  %v3675_v7 = vmul.f32 %v1166_v54, %v974_v63  ;;  %v1387_v23 = vmul.f32 %v3670_v3, %v3670_v3  ;;  %v3136_v31 = vld [vmem:[#allocation4 + $0x44] ss:$8 sps:$4 sm:$0xff]  }
 0x16e   : > { %v1054_v50 = vmul.f32 0.70710677, %v3651_v35  ;;  %3238 = verf.f32 %v1050_v43  ;;  %4999 = vst [vmem:[#allocation9_spill] sm:$0xff] %v3672_v4  ;;  %v1390_v24 = vmul.f32 %v3672_v4, %v3672_v4  ;;  %v3703_v30 = vmul.f32 0.5, %v3648_v33  ;;  %v3138_v58 = vld [vmem:[#allocation4 + $0x40] ss:$8 sps:$4 sm:$0xff]   ;;  %2334 = vmatprep.subr.bf16.mxu0 %v3136_v31 }
 0x16f   : > { %v3229_v61 = vpop.eup %3228  ;;  %3240 = verf.f32 %v1053_v46  ;;  %5000 = vst [vmem:[#allocation10_spill] sm:$0xff] %v3675_v7  ;;  %v1391_v28 = vmul.f32 %v3675_v7, %v3675_v7  ;;  %v3709_v38 = vmul.f32 0.5, %v3651_v35  ;;  %v3714_v41 = vadd.f32 %v3670_v3, %v3667_v62  ;;  %2335 = vmatpush1.bf16.msra.mxu0 %v3138_v58 }
 0x170   : > { %v3231_v2 = vpop.eup %3230  ;;  %3242 = verf.f32 %v1054_v50  ;;  %v1169_v13 = vadd.f32 1.0, %v3229_v61  ;;  %v3719_v45 = vadd.f32 %v1387_v23, %v1386_v19  ;;  %v3723_v46 = vadd.f32 %v3675_v7, %v3672_v4  ;;  %2336 = vmatprep.subr.bf16.mxu0 %v3139_v1 }
 0x171   : > { %v3233_v6 = vpop.eup %3232  ;;  %v1170_v21 = vadd.f32 1.0, %v3231_v2  ;;  %v3731_v52 = vadd.f32 %v1391_v28, %v1390_v24 }
 0x172   : > { %v3654_v40 = vpop.f32.mrb[12].mxu1  ;;  %v3235_v10 = vpop.eup %3234  ;;  %v1173_v25 = vadd.f32 1.0, %v3233_v6  ;;  %v3706_v37 = vmul.f32 %v1169_v13, %v977_v8 }
 0x173   : > { %v3657_v44 = vpop.f32.mrb[13].mxu1  ;;  %v1057_v55 = vmul.f32 0.70710677, %v3654_v40  ;;  %v1174_v26 = vadd.f32 1.0, %v3235_v10  ;;  %v3716_v42 = vmul.f32 %v1170_v21, %v978_v11  ;;  %v3141_v21 = vld [vmem:[#allocation4 + $0x50] ss:$8 sps:$4 sm:$0xff]  }
 0x174   : > { %v3660_v47 = vpop.f32.mrb[14].mxu1  ;;  %v1058_v59 = vmul.f32 0.70710677, %v3657_v44  ;;  %5001 = vst [vmem:[#allocation11_spill] sm:$0xff] %v3706_v37  ;;  %v3725_v48 = vmul.f32 %v1173_v25, %v981_v12  ;;  %v994_v56 = vmul.f32 0.5, %v3657_v44  ;;  %2337 = vmatpush1.bf16.msra.mxu0 %v3141_v21 }
 0x175   : > { %v3663_v51 = vpop.f32.mrb[15].mxu1  ;;  %v1061_v0 = vmul.f32 0.70710677, %v3660_v47  ;;  %3244 = verf.f32 %v1057_v55  ;;  %5002 = vst [vmem:[#allocation12_spill] sm:$0xff] %v3716_v42  ;;  %v3727_v49 = vmul.f32 %v1174_v26, %v982_v14  ;;  %v993_v55 = vmul.f32 0.5, %v3654_v40 }
 0x176   : > { %v1062_v5 = vmul.f32 0.70710677, %v3663_v51  ;;  %3246 = verf.f32 %v1058_v59  ;;  %5003 = vst [vmem:[#allocation13_spill] sm:$0xff] %v3725_v48  ;;  %v997_v44 = vmul.f32 0.5, %v3660_v47  ;;  %v1395_v6 = vmul.f32 %v3716_v42, %v3716_v42  ;;  %v3142_v25 = vld [vmem:[#allocation4 + $0x64] ss:$8 sps:$4 sm:$0xff]  }
 0x177   : > { %3248 = verf.f32 %v1061_v0  ;;  %v3237_v36 = vpop.eup %3236  ;;  %5004 = vst [vmem:[#allocation14_spill] sm:$0xff] %v3727_v49  ;;  %v1394_v0 = vmul.f32 %v3706_v37, %v3706_v37  ;;  %v998_v10 = vmul.f32 0.5, %v3663_v51  ;;  %v1398_v12 = vmul.f32 %v3725_v48, %v3725_v48  ;;  %2338 = vmatprep.subr.bf16.mxu0 %v3142_v25 }
 0x178   : > { %3250 = verf.f32 %v1062_v5  ;;  %v3239_v33 = vpop.eup %3238  ;;  %v1177_v54 = vadd.f32 1.0, %v3237_v36  ;;  %v1399_v14 = vmul.f32 %v3727_v49, %v3727_v49  ;;  %v3757_v20 = vadd.f32 %v3716_v42, %v3706_v37 }
 0x179   : > { %v3241_v35 = vpop.eup %3240  ;;  %v1178_v60 = vadd.f32 1.0, %v3239_v33  ;;  %v3768_v28 = vadd.f32 %v1395_v6, %v1394_v0 }
 0x17a   : > { %v3678_v9 = vpop.f32.mrb[16].mxu1  ;;  %v3243_v53 = vpop.eup %3242  ;;  %v1181_v16 = vadd.f32 1.0, %v3241_v35  ;;  %v3760_v51 = vmul.f32 %v1177_v54, %v3686_v17  ;;  %v3772_v17 = vadd.f32 %v1399_v14, %v1398_v12 }
 0x17b   : > { %v3683_v15 = vpop.f32.mrb[17].mxu1  ;;  %v1065_v27 = vmul.f32 0.70710677, %v3678_v9  ;;  %v1182_v13 = vadd.f32 1.0, %v3243_v53  ;;  %v3762_v23 = vmul.f32 %v1178_v60, %v986_v29  ;;  %v1001_v31 = vmul.f32 0.5, %v3678_v9 }
 0x17c   : > { %v3688_v18 = vpop.f32.mrb[18].mxu1  ;;  %v1066_v32 = vmul.f32 0.70710677, %v3683_v15  ;;  %5005 = vst [vmem:[#allocation15_spill] sm:$0xff] %v3760_v51  ;;  %v3775_v29 = vmul.f32 %v1181_v16, %v3703_v30  ;;  %v1402_v30 = vmul.f32 %v3760_v51, %v3760_v51  ;;  %v3145_v9 = vld [vmem:[#allocation4 + $0x74] ss:$8 sps:$4 sm:$0xff]  }
 0x17d   : > { %v3692_v22 = vpop.f32.mrb[19].mxu1  ;;  %v1069_v39 = vmul.f32 0.70710677, %v3688_v18  ;;  %3252 = verf.f32 %v1065_v27  ;;  %5006 = vst [vmem:[#allocation16_spill] sm:$0xff] %v3762_v23  ;;  %v3766_v27 = vadd.f32 %v3727_v49, %v3725_v48 }
 0x17e   : > { %v1070_v43 = vmul.f32 0.70710677, %v3692_v22  ;;  %3254 = verf.f32 %v1066_v32  ;;  %5007 = vst [vmem:[#allocation17_spill] sm:$0xff] %v3775_v29 }
 0x17f   : > { %v3245_v59 = vpop.eup %3244  ;;  %3256 = verf.f32 %v1069_v39  ;;  %v3778_v39 = vmul.f32 %v1182_v13, %v3709_v38  ;;  %v1403_v38 = vmul.f32 %v3762_v23, %v3762_v23 }
 0x180   : > { %v3247_v40 = vpop.eup %3246  ;;  %3258 = verf.f32 %v1070_v43  ;;  %v1185_v24 = vadd.f32 1.0, %v3245_v59  ;;  %v3144_v43 = vld [vmem:[#allocation4 + $0x60] ss:$8 sps:$4 sm:$0xff]  }
 0x181   : > { %v3249_v8 = vpop.eup %3248  ;;  %v1186_v26 = vadd.f32 1.0, %v3247_v40  ;;  %5008 = vst [vmem:[#allocation18_spill] sm:$0xff] %v3778_v39  ;;  %2339 = vmatpush1.bf16.msra.mxu0 %v3144_v43  ;;  %v3815_v14 = vadd.f32 %v1403_v38, %v1402_v30 }
 0x182   : > { %v3729_v50 = vpop.f32.mrb[20].mxu1  ;;  %v3251_v47 = vpop.eup %3250  ;;  %v1189_v32 = vadd.f32 1.0, %v3249_v8  ;;  %v3783_v53 = vmul.f32 %v1185_v24, %v993_v55  ;;  %v1005_v55 = vmul.f32 0.5, %v3688_v18  ;;  %v1006_v8 = vmul.f32 0.5, %v3692_v22  ;;  %2340 = vmatprep.subr.bf16.mxu0 %v3145_v9 }
 0x183   : > { %v3735_v57 = vpop.f32.mrb[21].mxu1  ;;  %v1073_v61 = vmul.f32 0.70710677, %v3729_v50  ;;  %v1190_v34 = vadd.f32 1.0, %v3251_v47  ;;  %v3792_v60 = vmul.f32 %v1186_v26, %v994_v56  ;;  %v1406_v18 = vmul.f32 %v3775_v29, %v3775_v29 }
 0x184   : > { %v3738_v63 = vpop.f32.mrb[22].mxu1  ;;  %v1074_v2 = vmul.f32 0.70710677, %v3735_v57  ;;  %5009 = vst [vmem:[#allocation19_spill] sm:$0xff] %v3783_v53  ;;  %v1410_v47 = vmul.f32 %v3783_v53, %v3783_v53 }
 0x185   : > { %v3744_v5 = vpop.f32.mrb[23].mxu1  ;;  %v1077_v11 = vmul.f32 0.70710677, %v3738_v63  ;;  %3260 = verf.f32 %v1073_v61  ;;  %5010 = vst [vmem:[#allocation20_spill] sm:$0xff] %v3792_v60  ;;  %v1002_v61 = vmul.f32 0.5, %v3683_v15  ;;  %v3799_v6 = vmul.f32 %v1190_v34, %v998_v10 }
 0x186   : > { %v1078_v19 = vmul.f32 0.70710677, %v3744_v5  ;;  %3262 = verf.f32 %v1074_v2  ;;  %v3797_v2 = vmul.f32 %v1189_v32, %v997_v44  ;;  %v3809_v15 = vadd.f32 %v3778_v39, %v3775_v29  ;;  %v3147_v10 = vld [vmem:[#allocation4 + $0x70] ss:$8 sps:$4 sm:$0xff]  }
 0x187   : > { %3264 = verf.f32 %v1077_v11  ;;  %v3253_v35 = vpop.eup %3252  ;;  %5012 = vst [vmem:[#allocation22_spill] sm:$0xff] %v3799_v6  ;;  %v3804_v11 = vadd.f32 %v3762_v23, %v3760_v51  ;;  %v1407_v44 = vmul.f32 %v3778_v39, %v3778_v39  ;;  %v1415_v34 = vmul.f32 %v3799_v6, %v3799_v6  ;;  %2341 = vmatpush1.bf16.msra.mxu0 %v3147_v10 }
 0x188   : > { %3266 = verf.f32 %v1078_v19  ;;  %v3255_v59 = vpop.eup %3254  ;;  %5011 = vst [vmem:[#allocation21_spill] sm:$0xff] %v3797_v2  ;;  %v1193_v16 = vadd.f32 1.0, %v3253_v35  ;;  %v1411_v19 = vmul.f32 %v3792_v60, %v3792_v60  ;;  %v1414_v32 = vmul.f32 %v3797_v2, %v3797_v2 }
 0x189   : > { %v3257_v40 = vpop.eup %3256  ;;  %v1194_v13 = vadd.f32 1.0, %v3255_v59  ;;  %v1010_v35 = vmul.f32 0.5, %v3735_v57  ;;  %v3831_v38 = vadd.f32 %v1407_v44, %v1406_v18  ;;  %v1013_v59 = vmul.f32 0.5, %v3738_v63 }
 0x18a   : > { %v3770_v36 = vpop.f32.mrb[24].mxu1  ;;  %v3259_v56 = vpop.eup %3258  ;;  %v1197_v24 = vadd.f32 1.0, %v3257_v40  ;;  %v3841_v57 = vmul.f32 %v1193_v16, %v1001_v31  ;;  %v3847_v44 = vadd.f32 %v3799_v6, %v3797_v2  ;;  %v3849_v63 = vadd.f32 %v1411_v19, %v1410_v47 }
 0x18b   : > { %v3781_v33 = vpop.f32.mrb[25].mxu1  ;;  %v1081_v54 = vmul.f32 0.70710677, %v3770_v36  ;;  %v1198_v25 = vadd.f32 1.0, %v3259_v56  ;;  %v3839_v56 = vadd.f32 %v3792_v60, %v3783_v53  ;;  %v3856_v53 = vadd.f32 %v1415_v34, %v1414_v32 }
 0x18c   : > { %v3786_v58 = vpop.f32.mrb[26].mxu1  ;;  %v1082_v0 = vmul.f32 0.70710677, %v3781_v33  ;;  %5013 = vst [vmem:[#allocation23_spill] sm:$0xff] %v3841_v57  ;;  %v1018_v2 = vmul.f32 0.5, %v3781_v33  ;;  %v1418_v19 = vmul.f32 %v3841_v57, %v3841_v57 }
 0x18d   : > { %v843_v1 = vpop.f32.mrb[27].mxu1  ;;  %v1085_v12 = vmul.f32 0.70710677, %v3786_v58  ;;  %3268 = verf.f32 %v1081_v54  ;;  %v1009_v54 = vmul.f32 0.5, %v3729_v50  ;;  %v3853_v10 = vmul.f32 %v1198_v25, %v1006_v8 }
 0x18e   : > { %v1086_v22 = vmul.f32 0.70710677, %v843_v1  ;;  %3270 = verf.f32 %v1082_v0  ;;  %v1014_v0 = vmul.f32 0.5, %v3744_v5  ;;  %v3851_v5 = vmul.f32 %v1197_v24, %v1005_v55 }
 0x18f   : > { %v3261_v21 = vpop.eup %3260  ;;  %3272 = verf.f32 %v1085_v12  ;;  %v3843_v12 = vmul.f32 %v1194_v13, %v1002_v61  ;;  %5016 = vst [vmem:[#allocation26_spill] sm:$0xff] %v3853_v10  ;;  %v1017_v61 = vmul.f32 0.5, %v3770_v36  ;;  %v1021_v55 = vmul.f32 0.5, %v3786_v58 }
 0x190   : > { %v3263_v43 = vpop.eup %3262  ;;  %3274 = verf.f32 %v1086_v22  ;;  %5015 = vst [vmem:[#allocation25_spill] sm:$0xff] %v3851_v5  ;;  %v1201_v60 = vadd.f32 1.0, %v3261_v21  ;;  %v1022_v8 = vmul.f32 0.5, %v843_v1  ;;  %v1422_v33 = vmul.f32 %v3851_v5, %v3851_v5 }
 0x191   : > { %v3265_v9 = vpop.eup %3264  ;;  %5014 = vst [vmem:[#allocation24_spill] sm:$0xff] %v3843_v12  ;;  %v1202_v31 = vadd.f32 1.0, %v3263_v43  ;;  %v1419_v21 = vmul.f32 %v3843_v12, %v3843_v12  ;;  %v3869_v25 = vadd.f32 %v3843_v12, %v3841_v57  ;;  %v1423_v58 = vmul.f32 %v3853_v10, %v3853_v10 }
 0x192   : > { %v3821_v26 = vpop.f32.mrb[28].mxu1  ;;  %v3267_v50 = vpop.eup %3266  ;;  %v1205_v13 = vadd.f32 1.0, %v3265_v9  ;;  %v3875_v32 = vmul.f32 %v1201_v60, %v1009_v54  ;;  %v3885_v60 = vadd.f32 %v3853_v10, %v3851_v5 }
 0x193   : > { %v3829_v30 = vpop.f32.mrb[29].mxu1  ;;  %v1089_v22 = vmul.f32 0.70710677, %v3821_v26  ;;  %v1206_v29 = vadd.f32 1.0, %v3267_v50  ;;  %v3877_v34 = vmul.f32 %v1202_v31, %v1010_v35  ;;  %v3887_v54 = vadd.f32 %v1419_v21, %v1418_v19 }
 0x194   : > { %v3835_v40 = vpop.f32.mrb[30].mxu1  ;;  %v1090_v16 = vmul.f32 0.70710677, %v3829_v30  ;;  %5017 = vst [vmem:[#allocation27_spill] sm:$0xff] %v3875_v32  ;;  %v3879_v50 = vmul.f32 %v1205_v13, %v1013_v59  ;;  %v1426_v13 = vmul.f32 %v3875_v32, %v3875_v32 }
 0x195   : > { %v853_v18 = vpop.f32.mrb[31].mxu1  ;;  %v1093_v47 = vmul.f32 0.70710677, %v3835_v40  ;;  %3276 = verf.f32 %v1089_v22  ;;  %5018 = vst [vmem:[#allocation28_spill] sm:$0xff] %v3877_v34  ;;  %v3881_v22 = vmul.f32 %v1206_v29, %v1014_v0  ;;  %v3889_v0 = vadd.f32 %v1423_v58, %v1422_v33 }
 0x196   : > { %3278 = verf.f32 %v1090_v16  ;;  %5019 = vst [vmem:[#allocation29_spill] sm:$0xff] %v3879_v50  ;;  %v1094_v29 = vmul.f32 0.70710677, %v853_v18  ;;  %v1430_v19 = vmul.f32 %v3879_v50, %v3879_v50 }
 0x197   : > { %v3269_v24 = vpop.eup %3268  ;;  %5020 = vst [vmem:[#allocation30_spill] sm:$0xff] %v3881_v22  ;;  %3280 = verf.f32 %v1093_v47  ;;  %v1427_v47 = vmul.f32 %v3877_v34, %v3877_v34  ;;  %v1431_v21 = vmul.f32 %v3881_v22, %v3881_v22 }
 0x198   : > { %v3271_v1 = vpop.eup %3270  ;;  %v1209_v31 = vadd.f32 1.0, %v3269_v24 }
 0x199   : > { %v3273_v6 = vpop.eup %3272  ;;  %v1210_v16 = vadd.f32 1.0, %v3271_v1  ;;  %v1025_v1 = vmul.f32 0.5, %v3821_v26  ;;  %v3920_v26 = vadd.f32 %v3881_v22, %v3879_v50 }
 0x19a   : > { %v890_v36 = vpop.f32.mrb[32].mxu1  ;;  %v3275_v35 = vpop.eup %3274  ;;  %v1213_v24 = vadd.f32 1.0, %v3273_v6  ;;  %v3903_v33 = vmul.f32 %v1209_v31, %v1017_v61  ;;  %v3916_v6 = vadd.f32 %v3877_v34, %v3875_v32 }
 0x19b   : > { %v1035_v43 = vmul.f32 0.70710677, %v890_v36  ;;  %v892_v9 = vpop.f32.mrb[33].mxu1  ;;  %v3905_v58 = vmul.f32 %v1210_v16, %v1018_v2 }
 0x19c   : > { %v1036_v57 = vmul.f32 0.70710677, %v892_v9  ;;  %v894_v12 = vpop.f32.mrb[34].mxu1  ;;  %5021 = vst [vmem:[#allocation31_spill] sm:$0xff] %v3903_v33  ;;  %v3929_v16 = vmul.f32 %v1213_v24, %v1021_v55 }
 0x19d   : > { %3282 = verf.f32 %v1035_v43  ;;  %v1039_v39 = vmul.f32 0.70710677, %v894_v12  ;;  %v896_v51 = vpop.f32.mrb[35].mxu1  ;;  %5022 = vst [vmem:[#allocation32_spill] sm:$0xff] %v3905_v58  ;;  %v3908_v43 = vmul.f32 0.5, %v3835_v40 }
 0x19e   : > { %3284 = verf.f32 %v1036_v57  ;;  %v1040_v59 = vmul.f32 0.70710677, %v896_v51  ;;  %v1214_v57 = vadd.f32 1.0, %v3275_v35  ;;  %v3927_v35 = vadd.f32 %v1431_v21, %v1430_v19  ;;  %5023 = vst [vmem:[#allocation33_spill] sm:$0xff] %v3929_v16 }
 0x19f   : > { %3286 = verf.f32 %v1039_v39  ;;  %v3901_v39 = vmul.f32 0.5, %v3829_v30  ;;  %v3277_v2 = vpop.eup %3276  ;;  %v971_v30 = vmul.f32 0.5, %v890_v36  ;;  %v972_v21 = vmul.f32 0.5, %v892_v9 }
 0x1a0   : > { %3288 = verf.f32 %v1040_v59  ;;  %v3910_v59 = vmul.f32 0.5, %v853_v18  ;;  %v3925_v18 = vadd.f32 %v1427_v47, %v1426_v13  ;;  %v3279_v31 = vpop.eup %3278  ;;  %v1434_v13 = vmul.f32 %v3903_v33, %v3903_v33 }
 0x1a1   : > { %3290 = verf.f32 %v1094_v29  ;;  %v3931_v29 = vmul.f32 %v1214_v57, %v1022_v8  ;;  %v3281_v22 = vpop.eup %3280  ;;  %v1435_v47 = vmul.f32 %v3905_v58, %v3905_v58  ;;  %v1217_v55 = vadd.f32 1.0, %v3277_v2 }
 0x1a2   : > { %v900_v5 = vpop.f32.mrb[36].mxu1  ;;  %v975_v8 = vmul.f32 0.5, %v894_v12  ;;  %v976_v57 = vmul.f32 0.5, %v896_v51  ;;  %v1438_v2 = vmul.f32 %v3929_v16, %v3929_v16  ;;  %v1218_v9 = vadd.f32 1.0, %v3279_v31 }
 0x1a3   : > { %v1043_v10 = vmul.f32 0.70710677, %v900_v5  ;;  %v3912_v23 = vpop.f32.mrb[37].mxu1  ;;  %5024 = vst [vmem:[#allocation34_spill] sm:$0xff] %v3931_v29  ;;  %v3947_v49 = vadd.f32 %v3931_v29, %v3929_v16  ;;  %v1439_v12 = vmul.f32 %v3931_v29, %v3931_v29  ;;  %v3961_v7 = vadd.f32 1.0, %v3281_v22 }
 0x1a4   : > { %v1044_v40 = vmul.f32 0.70710677, %v3912_v23  ;;  %v3923_v61 = vpop.f32.mrb[38].mxu1  ;;  %v979_v22 = vmul.f32 0.5, %v900_v5  ;;  %v980_v5 = vmul.f32 0.5, %v3912_v23 }
 0x1a5   : > { %3292 = verf.f32 %v1043_v10  ;;  %v1047_v32 = vmul.f32 0.70710677, %v3923_v61  ;;  %v3934_v50 = vpop.f32.mrb[39].mxu1 }
 0x1a6   : > { %3294 = verf.f32 %v1044_v40  ;;  %v1048_v36 = vmul.f32 0.70710677, %v3934_v50  ;;  %v3943_v40 = vadd.f32 %v3905_v58, %v3903_v33  ;;  %v3955_v33 = vadd.f32 %v1435_v47, %v1434_v13 }
 0x1a7   : > { %v3283_v19 = vpop.eup %3282  ;;  %3296 = verf.f32 %v1047_v32  ;;  %v3957_v58 = vmul.f32 %v1217_v55, %v1025_v1  ;;  %v3976_v13 = vadd.f32 %v1439_v12, %v1438_v2  ;;  %v983_v12 = vmul.f32 0.5, %v3923_v61 }
 0x1a8   : > { %v3285_v10 = vpop.eup %3284  ;;  %v1163_v24 = vadd.f32 1.0, %v3283_v19  ;;  %3298 = verf.f32 %v1048_v36 }
 0x1a9   : > { %v3287_v34 = vpop.eup %3286  ;;  %v1164_v48 = vadd.f32 1.0, %v3285_v10 }
 0x1aa   : > { %v3289_v32 = vpop.eup %3288  ;;  %v3953_v51 = vmul.f32 %v1163_v24, %v971_v30  ;;  %v1167_v36 = vadd.f32 1.0, %v3287_v34  ;;  %v910_v19 = vpop.f32.mrb[40].mxu1 }
 0x1ab   : > { %v3959_v10 = vmul.f32 %v1164_v48, %v972_v21  ;;  %v1168_v37 = vadd.f32 1.0, %v3289_v32  ;;  %v1051_v42 = vmul.f32 0.70710677, %v910_v19  ;;  %v912_v4 = vpop.f32.mrb[41].mxu1  ;;  %v3969_v30 = vpop.eup %3290 }
 0x1ac   : > { %v3963_v16 = vmul.f32 %v1167_v36, %v975_v8  ;;  %v1052_v29 = vmul.f32 0.70710677, %v912_v4  ;;  %v3965_v62 = vpop.f32.mrb[42].mxu1  ;;  %v1290_v34 = vadd.f32 %v3714_v41, %v3953_v51  ;;  %v1388_v41 = vmul.f32 %v3953_v51, %v3953_v51 }
 0x1ad   : > { %5025 = vst [vmem:[#allocation35_spill] sm:$0xff] %v3959_v10  ;;  %v3971_v31 = vmul.f32 %v1168_v37, %v976_v57  ;;  %3300 = verf.f32 %v1051_v42  ;;  %v1055_v48 = vmul.f32 0.70710677, %v3965_v62  ;;  %v3974_v1 = vpop.f32.mrb[43].mxu1  ;;  %v1389_v37 = vmul.f32 %v3959_v10, %v3959_v10 }
 0x1ae   : > { %5026 = vst [vmem:[#allocation36_spill] sm:$0xff] %v3963_v16  ;;  %3302 = verf.f32 %v1052_v29  ;;  %v1056_v47 = vmul.f32 0.70710677, %v3974_v1  ;;  %v1291_v55 = vadd.f32 %v1290_v34, %v3959_v10  ;;  %v1295_v42 = vadd.f32 %v3723_v46, %v3963_v16 }
 0x1af   : > { %v3293_v21 = vpop.eup %3292  ;;  %3304 = verf.f32 %v1055_v48  ;;  %v1392_v29 = vmul.f32 %v3963_v16, %v3963_v16  ;;  %v1451_v32 = vadd.f32 %v3719_v45, %v1388_v41  ;;  %v1393_v36 = vmul.f32 %v3971_v31, %v3971_v31 }
 0x1b0   : > { %v3295_v8 = vpop.eup %3294  ;;  %v1171_v24 = vadd.f32 1.0, %v3293_v21  ;;  %3306 = verf.f32 %v1056_v47  ;;  %1292 = vadd.xlane.f32.xlu0 %v1291_v55  ;;  %v1296_v23 = vadd.f32 %v1295_v42, %v3971_v31  ;;  %v4003_v45 = vmul.f32 %v1218_v9, %v3901_v39 }
 0x1b1   : > { %v3297_v57 = vpop.eup %3296  ;;  %v1172_v2 = vadd.f32 1.0, %v3295_v8  ;;  %v1456_v47 = vadd.f32 %v3731_v52, %v1392_v29  ;;  %v984_v8 = vmul.f32 0.5, %v3934_v50  ;;  %v1452_v61 = vadd.f32 %v1451_v32, %v1389_v37 }
 0x1b2   : > { %v3299_v34 = vpop.eup %3298  ;;  %v3993_v46 = vmul.f32 %v1171_v24, %v979_v22  ;;  %v1175_v48 = vadd.f32 1.0, %v3297_v57  ;;  %v920_v21 = vpop.f32.mrb[44].mxu1  ;;  %v988_v29 = vmul.f32 0.5, %v912_v4 }
 0x1b3   : > { %v3997_v55 = vmul.f32 %v1172_v2, %v980_v5  ;;  %v1176_v10 = vadd.f32 1.0, %v3299_v34  ;;  %v4000_v16 = vpop.f32.mrb[45].mxu1  ;;  %v1059_v22 = vmul.f32 0.70710677, %v920_v21  ;;  %v987_v5 = vmul.f32 0.5, %v910_v19  ;;  %1453 = vadd.xlane.f32.xlu1 %v1452_v61 }
 0x1b4   : > { %v4005_v41 = vmul.f32 %v1175_v48, %v983_v12  ;;  %v1060_v24 = vmul.f32 0.70710677, %v4000_v16  ;;  %1297 = vadd.xlane.f32.xlu0 %v1296_v23  ;;  %v4008_v42 = vpop.f32.mrb[46].mxu1  ;;  %v1457_v9 = vadd.f32 %v1456_v47, %v1393_v36  ;;  %v1300_v57 = vadd.f32 %v3757_v20, %v3993_v46 }
 0x1b5   : > { %v4010_v52 = vmul.f32 %v1176_v10, %v984_v8  ;;  %v1063_v50 = vmul.f32 0.70710677, %v4008_v42  ;;  %v4013_v37 = vpop.f32.mrb[47].mxu1  ;;  %3308 = verf.f32 %v1059_v22  ;;  %v1396_v4 = vmul.f32 %v3993_v46, %v3993_v46 }
 0x1b6   : > { %5027 = vst [vmem:[#allocation37_spill] sm:$0xff] %v4005_v41  ;;  %v1064_v39 = vmul.f32 0.70710677, %v4013_v37  ;;  %3310 = verf.f32 %v1060_v24  ;;  %v1305_v10 = vadd.f32 %v3766_v27, %v4005_v41  ;;  %v1397_v19 = vmul.f32 %v3997_v55, %v3997_v55 }
 0x1b7   : > { %v3301_v2 = vpop.eup %3300  ;;  %3312 = verf.f32 %v1063_v50  ;;  %v1301_v34 = vadd.f32 %v1300_v57, %v3997_v55  ;;  %v1400_v36 = vmul.f32 %v4005_v41, %v4005_v41  ;;  %1458 = vadd.xlane.f32.xlu1 %v1457_v9  ;;  %v1461_v23 = vadd.f32 %v3768_v28, %v1396_v4 }
 0x1b8   : > { %v3303_v12 = vpop.eup %3302  ;;  %v1179_v32 = vadd.f32 1.0, %v3301_v2  ;;  %3314 = verf.f32 %v1064_v39  ;;  %v1306_v27 = vadd.f32 %v1305_v10, %v4010_v52  ;;  %v991_v8 = vmul.f32 0.5, %v3965_v62 }
 0x1b9   : > { %v3305_v20 = vpop.eup %3304  ;;  %v1180_v48 = vadd.f32 1.0, %v3303_v12  ;;  %1302 = vadd.xlane.f32.xlu0 %v1301_v34  ;;  %v1401_v24 = vmul.f32 %v4010_v52, %v4010_v52  ;;  %v1466_v50 = vadd.f32 %v3772_v17, %v1400_v36  ;;  %v992_v39 = vmul.f32 0.5, %v3974_v1 }
 0x1ba   : > { %v3307_v47 = vpop.eup %3306  ;;  %v1183_v61 = vadd.f32 1.0, %v3305_v20  ;;  %v930_v22 = vpop.f32.mrb[48].mxu1  ;;  %v4033_v57 = vmul.f32 %v1179_v32, %v987_v5  ;;  %v1462_v4 = vadd.f32 %v1461_v23, %v1397_v19  ;;  %v4041_v20 = vadd.f32 1.0, %v3969_v30 }
 0x1bb   : > { %v1184_v9 = vadd.f32 1.0, %v3307_v47  ;;  %v1067_v2 = vmul.f32 0.70710677, %v930_v22  ;;  %v932_v10 = vpop.f32.mrb[49].mxu1  ;;  %v4036_v12 = vmul.f32 %v1180_v48, %v988_v29  ;;  %1307 = vadd.xlane.f32.xlu1 %v1306_v27  ;;  %v995_v1 = vmul.f32 0.5, %v920_v21 }
 0x1bc   : > { %5028 = vst [vmem:[#allocation38_spill] sm:$0xff] %v4033_v57  ;;  %v4038_v28 = vmul.f32 %v1183_v61, %v991_v8  ;;  %v1068_v62 = vmul.f32 0.70710677, %v932_v10  ;;  %v934_v34 = vpop.f32.mrb[50].mxu1  ;;  %v1467_v32 = vadd.f32 %v1466_v50, %v1401_v24  ;;  %v1310_v19 = vadd.f32 %v3804_v11, %v4033_v57  ;;  %v3148_v47 = vld [vmem:[#allocation4 + $0x84] ss:$8 sps:$4 sm:$0xff]  }
 0x1bd   : > { %v4043_v41 = vmul.f32 %v1184_v9, %v992_v39  ;;  %3316 = verf.f32 %v1067_v2  ;;  %v1071_v17 = vmul.f32 0.70710677, %v934_v34  ;;  %v4045_v5 = vpop.f32.mrb[51].mxu1  ;;  %1463 = vadd.xlane.f32.xlu0 %v1462_v4  ;;  %v1404_v36 = vmul.f32 %v4033_v57, %v4033_v57  ;;  %v3150_v8 = vld [vmem:[#allocation4 + $0x80] ss:$8 sps:$4 sm:$0xff]   ;;  %2342 = vmatprep.subr.bf16.mxu0 %v3148_v47 }
 0x1be   : > { %5029 = vst [vmem:[#allocation39_spill] sm:$0xff] %v4038_v28  ;;  %3318 = verf.f32 %v1068_v62  ;;  %v1072_v29 = vmul.f32 0.70710677, %v4045_v5  ;;  %v1315_v30 = vadd.f32 %v3809_v15, %v4038_v28  ;;  %v996_v27 = vmul.f32 0.5, %v4000_v16  ;;  %2343 = vmatpush1.bf16.msra.mxu0 %v3150_v8 }
 0x1bf   : > { %3320 = verf.f32 %v1071_v17  ;;  %v3309_v48 = vpop.eup %3308  ;;  %v1405_v21 = vmul.f32 %v4036_v12, %v4036_v12  ;;  %v1408_v23 = vmul.f32 %v4038_v28, %v4038_v28  ;;  %1468 = vadd.xlane.f32.xlu1 %v1467_v32  ;;  %v1311_v15 = vadd.f32 %v1310_v19, %v4036_v12 }
 0x1c0   : > { %3322 = verf.f32 %v1072_v29  ;;  %v3311_v61 = vpop.eup %3310  ;;  %v1187_v11 = vadd.f32 1.0, %v3309_v48  ;;  %v1316_v24 = vadd.f32 %v1315_v30, %v4043_v41  ;;  %v1471_v50 = vadd.f32 %v3815_v14, %v1404_v36 }
 0x1c1   : > { %v3313_v39 = vpop.eup %3312  ;;  %v1188_v16 = vadd.f32 1.0, %v3311_v61  ;;  %v999_v9 = vmul.f32 0.5, %v4008_v42  ;;  %v1000_v2 = vmul.f32 0.5, %v4013_v37  ;;  %v1409_v4 = vmul.f32 %v4043_v41, %v4043_v41  ;;  %1312 = vadd.xlane.f32.xlu0 %v1311_v15 }
 0x1c2   : > { %v940_v62 = vpop.f32.mrb[52].mxu1  ;;  %v3315_v17 = vpop.eup %3314  ;;  %v4066_v29 = vmul.f32 %v1187_v11, %v995_v1  ;;  %v1191_v32 = vadd.f32 1.0, %v3313_v39  ;;  %v1476_v14 = vadd.f32 %v3831_v38, %v1408_v23  ;;  %v1003_v48 = vmul.f32 0.5, %v930_v22 }
 0x1c3   : > { %v1075_v19 = vmul.f32 0.70710677, %v940_v62  ;;  %v942_v30 = vpop.f32.mrb[53].mxu1  ;;  %v4069_v36 = vmul.f32 %v1188_v16, %v996_v27  ;;  %v1192_v42 = vadd.f32 1.0, %v3315_v17  ;;  %v1004_v47 = vmul.f32 0.5, %v932_v10  ;;  %1317 = vadd.xlane.f32.xlu1 %v1316_v24 }
 0x1c4   : > { %5030 = vst [vmem:[#allocation40_spill] sm:$0xff] %v4066_v29  ;;  %v1076_v37 = vmul.f32 0.70710677, %v942_v30  ;;  %v4071_v61 = vpop.f32.mrb[54].mxu1  ;;  %v4073_v28 = vmul.f32 %v1191_v32, %v999_v9  ;;  %v1472_v1 = vadd.f32 %v1471_v50, %v1405_v21  ;;  %v1007_v39 = vmul.f32 0.5, %v934_v34 }
 0x1c5   : > { %5031 = vst [vmem:[#allocation41_spill] sm:$0xff] %v4069_v36  ;;  %3324 = verf.f32 %v1075_v19  ;;  %v4075_v11 = vpop.f32.mrb[55].mxu1  ;;  %v4077_v15 = vmul.f32 %v1192_v42, %v1000_v2  ;;  %v1079_v38 = vmul.f32 0.70710677, %v4071_v61  ;;  %v1477_v23 = vadd.f32 %v1476_v14, %v1409_v4  ;;  %v3151_v21 = vld [vmem:[#allocation4 + $0x94] ss:$8 sps:$4 sm:$0xff]  }
 0x1c6   : > { %5032 = vst [vmem:[#allocation42_spill] sm:$0xff] %v4073_v28  ;;  %3326 = verf.f32 %v1076_v37  ;;  %1473 = vadd.xlane.f32.xlu0 %v1472_v1  ;;  %v1080_v22 = vmul.f32 0.70710677, %v4075_v11  ;;  %v1320_v8 = vadd.f32 %v3839_v56, %v4066_v29  ;;  %v1325_v10 = vadd.f32 %v3847_v44, %v4073_v28  ;;  %v3153_v9 = vld [vmem:[#allocation4 + $0x90] ss:$8 sps:$4 sm:$0xff]   ;;  %2344 = vmatprep.subr.bf16.mxu0 %v3151_v21 }
 0x1c7   : > { %5033 = vst [vmem:[#allocation43_spill] sm:$0xff] %v4077_v15  ;;  %v3317_v27 = vpop.eup %3316  ;;  %3328 = verf.f32 %v1079_v38  ;;  %v1412_v34 = vmul.f32 %v4066_v29, %v4066_v29  ;;  %v1413_v16 = vmul.f32 %v4069_v36, %v4069_v36  ;;  %1478 = vadd.xlane.f32.xlu1 %v1477_v23  ;;  %v1008_v19 = vmul.f32 0.5, %v4045_v5  ;;  %2345 = vmatpush1.bf16.msra.mxu0 %v3153_v9  ;;  %v3156_v9 = vld [vmem:[#allocation4 + $0xa0] ss:$8 sps:$4 sm:$0xff]  }
 0x1c8   : > { %v3319_v24 = vpop.eup %3318  ;;  %v1195_v50 = vadd.f32 1.0, %v3317_v27  ;;  %3330 = verf.f32 %v1080_v22  ;;  %v1321_v56 = vadd.f32 %v1320_v8, %v4069_v36  ;;  %v1326_v4 = vadd.f32 %v1325_v10, %v4077_v15 }
 0x1c9   : > { %v3321_v2 = vpop.eup %3320  ;;  %v1196_v17 = vadd.f32 1.0, %v3319_v24  ;;  %v1011_v14 = vmul.f32 0.5, %v940_v62  ;;  %v1481_v37 = vadd.f32 %v3849_v63, %v1412_v34  ;;  %v1416_v23 = vmul.f32 %v4073_v28, %v4073_v28 }
 0x1ca   : > { %v3323_v44 = vpop.eup %3322  ;;  %v1199_v32 = vadd.f32 1.0, %v3321_v2  ;;  %v950_v42 = vpop.f32.mrb[56].mxu1  ;;  %v4093_v1 = vmul.f32 %v1195_v50, %v1003_v48  ;;  %1322 = vadd.xlane.f32.xlu0 %v1321_v56  ;;  %v4101_v8 = vmul.f32 %v3961_v7, %v3908_v43  ;;  %v1012_v62 = vmul.f32 0.5, %v942_v30  ;;  %v3154_v48 = vld [vmem:[#allocation4 + $0xa4] ss:$8 sps:$4 sm:$0xff]  }
 0x1cb   : > { %v1200_v38 = vadd.f32 1.0, %v3323_v44  ;;  %v1083_v27 = vmul.f32 0.70710677, %v950_v42  ;;  %v4095_v22 = vpop.f32.mrb[57].mxu1  ;;  %v4108_v21 = vmul.f32 %v1196_v17, %v1004_v47  ;;  %1327 = vadd.xlane.f32.xlu1 %v1326_v4  ;;  %v1482_v24 = vadd.f32 %v1481_v37, %v1413_v16  ;;  %2346 = vmatprep.subr.bf16.mxu0 %v3154_v48  ;;  %v3157_v17 = vld [vmem:[#allocation4 + $0xb4] ss:$8 sps:$4 sm:$0xff]  }
 0x1cc   : > { %5034 = vst [vmem:[#allocation44_spill] sm:$0xff] %v4093_v1  ;;  %v4103_v5 = vmul.f32 %v1199_v32, %v1007_v39  ;;  %v1084_v63 = vmul.f32 0.70710677, %v4095_v22  ;;  %v4106_v10 = vpop.f32.mrb[58].mxu1  ;;  %v1417_v30 = vmul.f32 %v4077_v15, %v4077_v15  ;;  %v1486_v47 = vadd.f32 %v3856_v53, %v1416_v23  ;;  %2347 = vmatpush1.bf16.msra.mxu0 %v3156_v9 }
 0x1cd   : > { %5036 = vst [vmem:[#allocation46_spill] sm:$0xff] %v4108_v21  ;;  %3332 = verf.f32 %v1083_v27  ;;  %v1087_v50 = vmul.f32 0.70710677, %v4106_v10  ;;  %v4111_v34 = vpop.f32.mrb[59].mxu1  ;;  %v4113_v7 = vmul.f32 %v1200_v38, %v1008_v19  ;;  %v1330_v16 = vadd.f32 %v3869_v25, %v4093_v1  ;;  %v3159_v19 = vld [vmem:[#allocation4 + $0xb0] ss:$8 sps:$4 sm:$0xff]   ;;  %2348 = vmatprep.subr.bf16.mxu0 %v3157_v17 }
 0x1ce   : > { %5035 = vst [vmem:[#allocation45_spill] sm:$0xff] %v4103_v5  ;;  %3334 = verf.f32 %v1084_v63  ;;  %v1088_v43 = vmul.f32 0.70710677, %v4111_v34  ;;  %1483 = vadd.xlane.f32.xlu0 %v1482_v24  ;;  %v1335_v2 = vadd.f32 %v3885_v60, %v4103_v5  ;;  %v1015_v44 = vmul.f32 0.5, %v4071_v61 }
 0x1cf   : > { %5037 = vst [vmem:[#allocation47_spill] sm:$0xff] %v4113_v7  ;;  %v3325_v39 = vpop.eup %3324  ;;  %3336 = verf.f32 %v1087_v50  ;;  %v1420_v32 = vmul.f32 %v4093_v1, %v4093_v1  ;;  %v1487_v38 = vadd.f32 %v1486_v47, %v1417_v30  ;;  %v1331_v53 = vadd.f32 %v1330_v16, %v4108_v21 }
 0x1d0   : > { %v3327_v56 = vpop.eup %3326  ;;  %v1203_v4 = vadd.f32 1.0, %v3325_v39  ;;  %3338 = verf.f32 %v1088_v43  ;;  %v1421_v25 = vmul.f32 %v4108_v21, %v4108_v21  ;;  %v1016_v27 = vmul.f32 0.5, %v4075_v11  ;;  %2349 = vmatpush1.bf16.msra.mxu0 %v3159_v19 }
 0x1d1   : > { %v1204_v37 = vadd.f32 1.0, %v3327_v56  ;;  %v3329_v60 = vpop.eup %3328  ;;  %v1019_v23 = vmul.f32 0.5, %v950_v42  ;;  %v1336_v63 = vadd.f32 %v1335_v2, %v4113_v7  ;;  %v1491_v48 = vadd.f32 %v3887_v54, %v1420_v32  ;;  %1488 = vadd.xlane.f32.xlu1 %v1487_v38  ;;  %v3162_v38 = vld [vmem:[#allocation4 + $0xc0] ss:$8 sps:$4 sm:$0xff]  }
 0x1d2   : > { %v4131_v61 = vpop.f32.mrb[60].mxu1  ;;  %v3331_v24 = vpop.eup %3330  ;;  %v4134_v50 = vmul.f32 %v1203_v4, %v1011_v14  ;;  %v1207_v9 = vadd.f32 1.0, %v3329_v60  ;;  %1332 = vadd.xlane.f32.xlu0 %v1331_v53  ;;  %v1424_v11 = vmul.f32 %v4103_v5, %v4103_v5  ;;  %v1425_v54 = vmul.f32 %v4113_v7, %v4113_v7  ;;  %v3160_v4 = vld [vmem:[#allocation4 + $0xc4] ss:$8 sps:$4 sm:$0xff]   ;;  %v3163_v60 = vld [vmem:[#allocation4 + $0xd4] ss:$8 sps:$4 sm:$0xff]  }
 0x1d3   : > { %v1091_v43 = vmul.f32 0.70710677, %v4131_v61  ;;  %v4137_v30 = vpop.f32.mrb[61].mxu1  ;;  %v4141_v42 = vmul.f32 %v1204_v37, %v1012_v62  ;;  %v1208_v39 = vadd.f32 1.0, %v3331_v24  ;;  %v1492_v2 = vadd.f32 %v1491_v48, %v1421_v25  ;;  %2350 = vmatprep.subr.bf16.mxu0 %v3160_v4 }
 0x1d4   : > { %5038 = vst [vmem:[#allocation48_spill] sm:$0xff] %v4134_v50  ;;  %v1092_v47 = vmul.f32 0.70710677, %v4137_v30  ;;  %v4144_v16 = vpop.f32.mrb[62].mxu1  ;;  %v4148_v14 = vmul.f32 %v1207_v9, %v1015_v44  ;;  %v1020_v32 = vmul.f32 0.5, %v4095_v22  ;;  %v1496_v44 = vadd.f32 %v3889_v0, %v1424_v11  ;;  %2351 = vmatpush1.bf16.msra.mxu0 %v3162_v38 }
 0x1d5   : > { %5039 = vst [vmem:[#allocation49_spill] sm:$0xff] %v4141_v42  ;;  %3340 = verf.f32 %v1091_v43  ;;  %v1095_v17 = vmul.f32 0.70710677, %v4144_v16  ;;  %v4151_v56 = vpop.f32.mrb[63].mxu1  ;;  %v4153_v62 = vmul.f32 %v1208_v39, %v1016_v27  ;;  %1337 = vadd.xlane.f32.xlu1 %v1336_v63  ;;  %v1340_v19 = vadd.f32 %v3916_v6, %v4134_v50  ;;  %2352 = vmatprep.subr.bf16.mxu0 %v3163_v60 }
 0x1d6   : > { %5040 = vst [vmem:[#allocation50_spill] sm:$0xff] %v4148_v14  ;;  %3342 = verf.f32 %v1092_v47  ;;  %v1096_v37 = vmul.f32 0.70710677, %v4151_v56  ;;  %1493 = vadd.xlane.f32.xlu0 %v1492_v2  ;;  %v1345_v25 = vadd.f32 %v3920_v26, %v4148_v14  ;;  %v1023_v22 = vmul.f32 0.5, %v4106_v10  ;;  %v3165_v26 = vld [vmem:[#allocation4 + $0xd0] ss:$8 sps:$4 sm:$0xff]  }
 0x1d7   : > { %5041 = vst [vmem:[#allocation51_spill] sm:$0xff] %v4153_v62  ;;  %v3333_v53 = vpop.eup %3332  ;;  %3344 = verf.f32 %v1095_v17  ;;  %v1428_v24 = vmul.f32 %v4134_v50, %v4134_v50  ;;  %v1497_v43 = vadd.f32 %v1496_v44, %v1425_v54  ;;  %v1341_v0 = vadd.f32 %v1340_v19, %v4141_v42  ;;  %v5071_v50 = vld [vmem:[#allocation22_spill] sm:$0xff] }
 0x1d8   : > { %v3335_v27 = vpop.eup %3334  ;;  %v1211_v48 = vadd.f32 1.0, %v3333_v53  ;;  %3346 = verf.f32 %v1096_v37  ;;  %v1429_v6 = vmul.f32 %v4141_v42, %v4141_v42  ;;  %v1432_v2 = vmul.f32 %v4148_v14, %v4148_v14  ;;  %v3166_v37 = vld [vmem:[#allocation4 + $0xe4] ss:$8 sps:$4 sm:$0xff]   ;;  %2353 = vmatpush1.bf16.msra.mxu0 %v3165_v26 }
 0x1d9   : > { %v3337_v63 = vpop.eup %3336  ;;  %v1212_v9 = vadd.f32 1.0, %v3335_v27  ;;  %v1501_v10 = vadd.f32 %v3925_v18, %v1428_v24  ;;  %1498 = vadd.xlane.f32.xlu1 %v1497_v43  ;;  %v1346_v4 = vadd.f32 %v1345_v25, %v4153_v62  ;;  %v1741_v38 = vlaneseq  ;;  %v3168_v25 = vld [vmem:[#allocation4 + $0xe0] ss:$8 sps:$4 sm:$0xff]   ;;  %2354 = vmatprep.subr.bf16.mxu0 %v3166_v37 }
 0x1da   : > { %v3339_v11 = vpop.eup %3338  ;;  %v4168_v39 = vmul.f32 %v1211_v48, %v1019_v23  ;;  %v1215_v47 = vadd.f32 1.0, %v3337_v63  ;;  %1342 = vadd.xlane.f32.xlu0 %v1341_v0  ;;  %v1433_v23 = vmul.f32 %v4153_v62, %v4153_v62  ;;  %v1506_v18 = vadd.f32 %v3927_v35, %v1432_v2 }
 0x1db   : > { %v4173_v17 = vmul.f32 %v1212_v9, %v1020_v32  ;;  %v1216_v54 = vadd.f32 1.0, %v3339_v11  ;;  %v1024_v32 = vmul.f32 0.5, %v4111_v34  ;;  %v1502_v19 = vadd.f32 %v1501_v10, %v1429_v6  ;;  %v4200_v34 = vld [vmem:[%s4896_s3] sm:$0xf] }
 0x1dc   : > { %5042 = vst [vmem:[#allocation52_spill] sm:$0xff] %v4168_v39  ;;  %v4176_v53 = vmul.f32 %v1215_v47, %v1023_v22  ;;  %v1350_v44 = vadd.f32 %v3943_v40, %v4168_v39  ;;  %v1436_v60 = vmul.f32 %v4168_v39, %v4168_v39  ;;  %v4186_v27 = vshrl.u32 %v1741_v38, 7  ;;  %v4214_v47 = vld [vmem:[%s4897_s4] sm:$0xf]  ;;  %2355 = vmatpush1.bf16.msra.mxu0 %v3168_v25  ;;  %v3174_v25 = vld [vmem:[#allocation4 + $0x104] ss:$8 sps:$4 sm:$0xff]  }
 0x1dd   : > { %5043 = vst [vmem:[#allocation53_spill] sm:$0xff] %v4173_v17  ;;  %v4190_v48 = vmul.f32 %v4041_v20, %v3910_v59  ;;  %v1027_v22 = vmul.f32 0.5, %v4131_v61  ;;  %v1359_v35 = vadd.f32 %v4003_v45, %v3957_v58  ;;  %v1442_v40 = vmul.f32 %v3957_v58, %v3957_v58  ;;  %1347 = vadd.xlane.f32.xlu1 %v1346_v4  ;;  %v3169_v61 = vld [vmem:[#allocation4 + $0xf4] ss:$8 sps:$4 sm:$0xff]   ;;  %v3171_v4 = vld [vmem:[#allocation4 + $0xf0] ss:$8 sps:$4 sm:$0xff]  }
 0x1de   : > { %5044 = vst [vmem:[#allocation54_spill] sm:$0xff] %v4176_v53  ;;  %v4202_v63 = vmul.f32 %v1216_v54, %v1024_v32  ;;  %1503 = vadd.xlane.f32.xlu0 %v1502_v19  ;;  %v1351_v59 = vadd.f32 %v1350_v44, %v4173_v17  ;;  %v1355_v20 = vadd.f32 %v3947_v49, %v4176_v53  ;;  %v1751_v9 = vsub.s32 2, %v4186_v27 }
 0x1df   : > { %v3341_v24 = vpop.eup %3340  ;;  %v1028_v6 = vmul.f32 0.5, %v4137_v30  ;;  %v1507_v26 = vadd.f32 %v1506_v18, %v1433_v23  ;;  %v1437_v11 = vmul.f32 %v4173_v17, %v4173_v17  ;;  %v1511_v49 = vadd.f32 %v3955_v33, %v1436_v60  ;;  %2356 = vmatprep.subr.bf16.mxu0 %v3169_v61 }
 0x1e0   : > { %5045 = vst [vmem:[#allocation55_spill] sm:$0xff] %v4202_v63  ;;  %v3343_v43 = vpop.eup %3342  ;;  %v1219_v0 = vadd.f32 1.0, %v3341_v24  ;;  %v1440_v54 = vmul.f32 %v4176_v53, %v4176_v53  ;;  %v4220_v30 = vrot.slane %v4200_v34, %v1751_v9  ;;  %v1031_v23 = vmul.f32 0.5, %v4144_v16  ;;  %2357 = vmatpush1.bf16.msra.mxu0 %v3171_v4 }
 0x1e1   : > { %v3345_v10 = vpop.eup %3344  ;;  %v1220_v2 = vadd.f32 1.0, %v3343_v43  ;;  %v1443_v44 = vmul.f32 %v4003_v45, %v4003_v45  ;;  %1508 = vadd.xlane.f32.xlu1 %v1507_v26  ;;  %v1356_v19 = vadd.f32 %v1355_v20, %v4202_v63  ;;  %v4231_v60 = vrot.slane %v4214_v47, %v1751_v9  ;;  %2439 = vmatprep.subr.bf16.mxu0 %v3174_v25 }
 0x1e2   : > { %v3347_v37 = vpop.eup %3346  ;;  %v4222_v38 = vmul.f32 %v1219_v0, %v1027_v22  ;;  %v1223_v18 = vadd.f32 1.0, %v3345_v10  ;;  %1352 = vadd.xlane.f32.xlu0 %v1351_v59  ;;  %v1032_v16 = vmul.f32 0.5, %v4151_v56  ;;  %v1364_v61 = vadd.f32 %v4190_v48, %v4101_v8 }
 0x1e3   : > { %v4227_v32 = vmul.f32 %v1220_v2, %v1028_v6  ;;  %v1224_v33 = vadd.f32 1.0, %v3347_v37  ;;  %v1512_v43 = vadd.f32 %v1511_v49, %v1437_v11  ;;  %v1441_v0 = vmul.f32 %v4202_v63, %v4202_v63 }
 0x1e4   : > { %5046 = vst [vmem:[#allocation56_spill] sm:$0xff] %v4222_v38  ;;  %v4233_v22 = vmul.f32 %v1223_v18, %v1031_v23  ;;  %v1360_v24 = vadd.f32 %v1359_v35, %v4222_v38  ;;  %v1516_v59 = vadd.f32 %v3976_v13, %v1440_v54  ;;  %v1444_v20 = vmul.f32 %v4222_v38, %v4222_v38 }
 0x1e5   : > { %5047 = vst [vmem:[#allocation57_spill] sm:$0xff] %v4227_v32  ;;  %v1520_v9 = vadd.f32 %v1443_v44, %v1442_v40  ;;  %v1446_v6 = vmul.f32 %v4101_v8, %v4101_v8  ;;  %v1447_v56 = vmul.f32 %v4190_v48, %v4190_v48  ;;  %v4248_v35 = vmul.f32 %v1224_v33, %v1032_v16 }
 0x1e6   : > { %5048 = vst [vmem:[#allocation58_spill] sm:$0xff] %v4233_v22  ;;  %1357 = vadd.xlane.f32.xlu1 %v1356_v19  ;;  %1513 = vadd.xlane.f32.xlu0 %v1512_v43  ;;  %v1361_v26 = vadd.f32 %v1360_v24, %v4227_v32  ;;  %v1365_v13 = vadd.f32 %v1364_v61, %v4233_v22 }
 0x1e7   : > { %5049 = vst [vmem:[#allocation59_spill] sm:$0xff] %v4248_v35  ;;  %v1517_v11 = vadd.f32 %v1516_v59, %v1441_v0  ;;  %v1445_v10 = vmul.f32 %v4227_v32, %v4227_v32  ;;  %v1521_v40 = vadd.f32 %v1520_v9, %v1444_v20  ;;  %v1448_v2 = vmul.f32 %v4233_v22, %v4233_v22  ;;  %v5059_v22 = vld [vmem:[#allocation37_spill] sm:$0xff] }
 0x1e8   : > { %v1366_v49 = vadd.f32 %v1365_v13, %v4248_v35  ;;  %v1525_v54 = vadd.f32 %v1447_v56, %v1446_v6  ;;  %v1449_v37 = vmul.f32 %v4248_v35, %v4248_v35  ;;  %v1747_v20 = vsub.s32 1, %v4186_v27 }
 0x1e9   : > { %v1522_v4 = vadd.f32 %v1521_v40, %v1445_v10 }
 0x1ea   : > { %1518 = vadd.xlane.f32.xlu1 %v1517_v11  ;;  %1362 = vadd.xlane.f32.xlu0 %v1361_v26  ;;  %v1526_v23 = vadd.f32 %v1525_v54, %v1448_v2  ;;  %v1743_v26 = vsub.s32 0, %v4186_v27  ;;  %v1755_v11 = vsub.s32 3, %v4186_v27  ;;  %v4273_v2 = vrot.slane %v4200_v34, %v1747_v20 }
 0x1ec   : > { %v1527_v18 = vadd.f32 %v1526_v23, %v1449_v37  ;;  %v4281_v23 = vrot.slane %v4200_v34, %v1743_v26 }
 0x1ee   : > { %1367 = vadd.xlane.f32.xlu1 %v1366_v49  ;;  %1523 = vadd.xlane.f32.xlu0 %v1522_v4  ;;  %v4276_v49 = vrot.slane %v4214_v47, %v1747_v20 }
 0x1f2   : > { %1528 = vadd.xlane.f32.xlu1 %v1527_v18  ;;  %v4284_v18 = vrot.slane %v4214_v47, %v1743_v26 }
 0x23d   : > { %v1293_v44 = vpop.xlane.xlu0 %1292 }
 0x23e   : > { %v4259_v33 = vmul.f32 0.001953125, %v1293_v44 }
 0x240   : > { %v1546_v19 = vmul.f32 %v4259_v33, %v4259_v33  ;;  %v1454_v16 = vpop.xlane.xlu1 %1453 }
 0x241   : > { %v1298_v25 = vpop.xlane.xlu0 %1297  ;;  %v1530_v61 = vmul.f32 0.001953125, %v1454_v16  ;;  %v1582_v16 = vsub.f32 %v3953_v51, %v4259_v33 }
 0x242   : > { %v4263_v24 = vmul.f32 0.001953125, %v1298_v25  ;;  %v4292_v25 = vrot.slane %v4214_v47, %v1755_v11  ;;  %v5053_v47 = vld [vmem:[#allocation35_spill] sm:$0xff] }
 0x243   : > { %v1562_v43 = vsub.f32 %v1530_v61, %v1546_v19  ;;  %v4289_v19 = vrot.slane %v4200_v34, %v1755_v11  ;;  %v1581_v61 = vsub.f32 %v3670_v3, %v4259_v33  ;;  %v5052_v34 = vld [vmem:[#allocation10_spill] sm:$0xff]  ;;  %v1583_v26 = vsub.f32 %v5053_v47, %v4259_v33  ;;  %v5054_v3 = vld [vmem:[#allocation9_spill] sm:$0xff] }
 0x244   : > { %v1547_v0 = vmul.f32 %v4263_v24, %v4263_v24  ;;  %v1459_v59 = vpop.xlane.xlu1 %1458 }
 0x245   : > { %v1644_v9 = vadd.f32 1e-05, %v1562_v43  ;;  %v1531_v6 = vmul.f32 0.001953125, %v1459_v59  ;;  %v5050_v43 = vld [vmem:[#allocation8_spill] sm:$0xff] }
 0x246   : > { %v1303_v56 = vpop.xlane.xlu0 %1302  ;;  %v5051_v59 = vld [vmem:[#allocation36_spill] sm:$0xff] }
 0x247   : > { %v4269_v13 = vmul.f32 0.001953125, %v1303_v56  ;;  %3348 = vrsqrt.f32 %v1644_v9  ;;  %v1563_v10 = vsub.f32 %v1531_v6, %v1547_v0  ;;  %v1580_v0 = vsub.f32 %v5050_v43, %v4259_v33  ;;  %v5056_v43 = vld [vmem:[#allocation11_spill] sm:$0xff] }
 0x248   : > { %v1308_v40 = vpop.xlane.xlu1 %1307  ;;  %v1586_v20 = vsub.f32 %v5051_v59, %v4263_v24  ;;  %v1585_v56 = vsub.f32 %v5052_v34, %v4263_v24 }
 0x249   : > { %v1645_v54 = vadd.f32 1e-05, %v1563_v10  ;;  %v4278_v4 = vmul.f32 0.001953125, %v1308_v40  ;;  %v1548_v27 = vmul.f32 %v4269_v13, %v4269_v13  ;;  %v1584_v10 = vsub.f32 %v5054_v3, %v4263_v24 }
 0x24a   : > { %v1464_v37 = vpop.xlane.xlu0 %1463  ;;  %v1587_v40 = vsub.f32 %v3971_v31, %v4263_v24  ;;  %v5060_v31 = vld [vmem:[#allocation16_spill] sm:$0xff] }
 0x24b   : > { %v1532_v44 = vmul.f32 0.001953125, %v1464_v37  ;;  %3350 = vrsqrt.f32 %v1645_v54  ;;  %v1549_v51 = vmul.f32 %v4278_v4, %v4278_v4 }
 0x24c   : > { %v1469_v6 = vpop.xlane.xlu1 %1468 }
 0x24d   : > { %v1564_v9 = vsub.f32 %v1532_v44, %v1548_v27  ;;  %v1533_v11 = vmul.f32 0.001953125, %v1469_v6  ;;  %v5055_v27 = vld [vmem:[#allocation12_spill] sm:$0xff]  ;;  %v5057_v6 = vld [vmem:[#allocation14_spill] sm:$0xff]  ;;  %v5061_v44 = vld [vmem:[#allocation15_spill] sm:$0xff] }
 0x24e   : > { %v1313_v37 = vpop.xlane.xlu0 %1312 }
 0x24f   : > { %v1646_v54 = vadd.f32 1e-05, %v1564_v9  ;;  %v1565_v34 = vsub.f32 %v1533_v11, %v1549_v51  ;;  %v4318_v47 = vmul.f32 0.001953125, %v1313_v37  ;;  %v5058_v9 = vld [vmem:[#allocation13_spill] sm:$0xff] }
 0x250   : > { %v1318_v24 = vpop.xlane.xlu1 %1317 }
 0x251   : > { %3352 = vrsqrt.f32 %v1646_v54  ;;  %v3349_v51 = vpop.eup %3348  ;;  %v1647_v11 = vadd.f32 1e-05, %v1565_v34  ;;  %v4330_v37 = vmul.f32 0.001953125, %v1318_v24  ;;  %v1550_v3 = vmul.f32 %v4318_v47, %v4318_v47  ;;  %v5062_v24 = vld [vmem:[#allocation18_spill] sm:$0xff] }
 0x252   : > { %v1677_v35 = vmul.f32 %v3349_v51, %v1581_v61  ;;  %v1676_v32 = vmul.f32 %v3349_v51, %v1580_v0  ;;  %v1679_v59 = vmul.f32 %v3349_v51, %v1583_v26  ;;  %v5063_v61 = vld [vmem:[#allocation17_spill] sm:$0xff] }
 0x253   : > { %v1474_v38 = vpop.xlane.xlu0 %1473  ;;  %3354 = vrsqrt.f32 %v1647_v11  ;;  %v1551_v34 = vmul.f32 %v4330_v37, %v4330_v37 }
 0x254   : > { %v1534_v39 = vmul.f32 0.001953125, %v1474_v38  ;;  %v1479_v63 = vpop.xlane.xlu1 %1478  ;;  %v1762_v17 = vmul.f32 %v4273_v2, %v1677_v35  ;;  %v1761_v54 = vmul.f32 %v4281_v23, %v1676_v32  ;;  %v1764_v14 = vmul.f32 %v4289_v19, %v1679_v59 }
 0x255   : > { %v3351_v53 = vpop.eup %3350  ;;  %v1535_v11 = vmul.f32 0.001953125, %v1479_v63  ;;  %v1678_v38 = vmul.f32 %v3349_v51, %v1582_v16 }
 0x256   : > { %v1566_v26 = vsub.f32 %v1534_v39, %v1550_v3  ;;  %v1681_v42 = vmul.f32 %v3351_v53, %v1585_v56  ;;  %v1847_v33 = vadd.f32 %v4276_v49, %v1762_v17  ;;  %v1680_v5 = vmul.f32 %v3351_v53, %v1584_v10 }
 0x257   : > { %v1323_v62 = vpop.xlane.xlu0 %1322  ;;  %v1846_v35 = vadd.f32 %v4284_v18, %v1761_v54  ;;  %v1567_v1 = vsub.f32 %v1535_v11, %v1551_v34  ;;  %v1683_v0 = vmul.f32 %v3351_v53, %v1587_v40  ;;  %v4356_v16 = vadd.f32 %v4292_v25, %v1764_v14  ;;  %v5068_v14 = vld [vmem:[#allocation19_spill] sm:$0xff] }
 0x258   : > { %v1648_v32 = vadd.f32 1e-05, %v1566_v26  ;;  %v4351_v7 = vmul.f32 0.001953125, %v1323_v62  ;;  %v1328_v59 = vpop.xlane.xlu1 %1327  ;;  %v1766_v39 = vmul.f32 %v4273_v2, %v1681_v42  ;;  %v1765_v63 = vmul.f32 %v4281_v23, %v1680_v5  ;;  %v5067_v5 = vld [vmem:[#allocation20_spill] sm:$0xff]  ;;  %v3177_v54 = vld [vmem:[#allocation4 + $0x114] ss:$8 sps:$4 sm:$0xff]  }
 0x259   : > { %5065 = vst [vmem:[#allocation36_spill] sm:$0xff] %v4356_v16  ;;  %v1682_v3 = vmul.f32 %v3351_v53, %v1586_v20  ;;  %v1649_v56 = vadd.f32 1e-05, %v1567_v1  ;;  %v4358_v17 = vmul.f32 0.001953125, %v1328_v59  ;;  %v5069_v34 = vsub.f32 %v5055_v27, %v4269_v13  ;;  %v3172_v59 = vld [vmem:[#allocation4 + $0x100] ss:$8 sps:$4 sm:$0xff]  }
 0x25a   : > { %5064 = vst [vmem:[#allocation8_spill] sm:$0xff] %v4351_v7  ;;  %3356 = vrsqrt.f32 %v1648_v32  ;;  %v1552_v10 = vmul.f32 %v4351_v7, %v4351_v7  ;;  %v1851_v40 = vadd.f32 %v4276_v49, %v1766_v39  ;;  %v1850_v42 = vadd.f32 %v4284_v18, %v1765_v63  ;;  %v5072_v27 = vld [vmem:[#allocation21_spill] sm:$0xff] }
 0x25b   : > { %5066 = vst [vmem:[#allocation10_spill] sm:$0xff] %v4358_v17  ;;  %v4362_v51 = vpop.eup %3352  ;;  %v1484_v62 = vpop.xlane.xlu0 %1483  ;;  %3358 = vrsqrt.f32 %v1649_v56  ;;  %v1553_v20 = vmul.f32 %v4358_v17, %v4358_v17  ;;  %v5070_v39 = vsub.f32 %v5056_v43, %v4269_v13  ;;  %v5073_v43 = vsub.f32 %v5057_v6, %v4278_v4  ;;  %v3175_v6 = vld [vmem:[#allocation4 + $0x110] ss:$8 sps:$4 sm:$0xff]  }
 0x25c   : > { %v1536_v1 = vmul.f32 0.001953125, %v1484_v62  ;;  %v1685_v26 = vmul.f32 %v4362_v51, %v5069_v34  ;;  %v1975_v11 = vpack.c.bf16 %v1851_v40, %v1847_v33  ;;  %v1974_v32 = vpack.c.bf16 %v1850_v42, %v1846_v35 }
 0x25d   : > { %v1684_v63 = vmul.f32 %v4362_v51, %v5070_v39  ;;  %v4382_v62 = vpop.eup %3354  ;;  %v1768_v33 = vmul.f32 %v4289_v19, %v1683_v0  ;;  %v5074_v39 = vsub.f32 %v5058_v9, %v4278_v4 }
 0x25e   : > { %v1568_v53 = vsub.f32 %v1536_v1, %v1552_v10  ;;  %v1770_v21 = vmul.f32 %v4273_v2, %v1685_v26  ;;  %v1489_v35 = vpop.xlane.xlu1 %1488  ;;  %2358 = vmatprep.mubr.bf16.mxu0 %v1975_v11  ;;  %v1689_v42 = vmul.f32 %v4382_v62, %v5073_v43  ;;  %v4398_v26 = vmul.f32 %v4220_v30, %v1678_v38 }
 0x25f   : > { %v1333_v40 = vpop.xlane.xlu0 %1332  ;;  %v1688_v10 = vmul.f32 %v4382_v62, %v5074_v39  ;;  %v1769_v1 = vmul.f32 %v4281_v23, %v1684_v63  ;;  %v1537_v0 = vmul.f32 0.001953125, %v1489_v35  ;;  %2359 = vmatmul.mubr.bf16.vlgmr.msra.gmra.mrb[0].mxu0 %v1974_v32  ;;  %v4407_v63 = vadd.f32 %v4292_v25, %v1768_v33  ;;  %v3180_v32 = vld [vmem:[#allocation4 + $0x124] ss:$8 sps:$4 sm:$0xff]  }
 0x260   : > { %v1650_v34 = vadd.f32 1e-05, %v1568_v53  ;;  %v4400_v56 = vmul.f32 0.001953125, %v1333_v40  ;;  %v1855_v11 = vadd.f32 %v4276_v49, %v1770_v21  ;;  %2440 = vmatpush1.bf16.msra.mxu0 %v3172_v59  ;;  %v1774_v43 = vmul.f32 %v4273_v2, %v1689_v42  ;;  %v5077_v21 = vld [vmem:[#allocation24_spill] sm:$0xff] }
 0x261   : > { %v1773_v9 = vmul.f32 %v4281_v23, %v1688_v10  ;;  %v1854_v39 = vadd.f32 %v4284_v18, %v1769_v1  ;;  %5076 = vst [vmem:[#allocation9_spill] sm:$0xff] %v4407_v63  ;;  %v1569_v38 = vsub.f32 %v1537_v0, %v1553_v20  ;;  %2441 = vmatprep.subr.bf16.mxu0 %v3177_v54  ;;  %v5078_v1 = vld [vmem:[#allocation23_spill] sm:$0xff] }
 0x262   : > { %5075 = vst [vmem:[#allocation35_spill] sm:$0xff] %v4400_v56  ;;  %3360 = vrsqrt.f32 %v1650_v34  ;;  %v1554_v53 = vmul.f32 %v4400_v56, %v4400_v56  ;;  %v1338_v35 = vpop.xlane.xlu1 %1337  ;;  %v1859_v42 = vadd.f32 %v4276_v49, %v1774_v43  ;;  %v1767_v59 = vmul.f32 %v4220_v30, %v1682_v3  ;;  %v3178_v43 = vld [vmem:[#allocation4 + $0x120] ss:$8 sps:$4 sm:$0xff]  }
 0x263   : > { %v1494_v40 = vpop.xlane.xlu0 %1493  ;;  %v1858_v10 = vadd.f32 %v4284_v18, %v1773_v9  ;;  %v1651_v0 = vadd.f32 1e-05, %v1569_v38  ;;  %v4421_v54 = vmul.f32 0.001953125, %v1338_v35  ;;  %v5079_v9 = vsub.f32 %v5060_v31, %v4318_v47 }
 0x264   : > { %v4419_v34 = vpop.eup %3356  ;;  %v1538_v28 = vmul.f32 0.001953125, %v1494_v40  ;;  %2442 = vmatpush1.bf16.msra.mxu0 %v3175_v6  ;;  %v1979_v29 = vpack.c.bf16 %v1859_v42, %v1855_v11  ;;  %v5080_v20 = vsub.f32 %v5061_v44, %v4318_v47  ;;  %v3183_v11 = vld [vmem:[#allocation4 + $0x134] ss:$8 sps:$4 sm:$0xff]   ;;  %v5082_v44 = vsub.f32 %v5062_v24, %v4330_v37  ;;  %v3181_v24 = vld [vmem:[#allocation4 + $0x130] ss:$8 sps:$4 sm:$0xff]  }
 0x265   : > { %v1978_v15 = vpack.c.bf16 %v1858_v10, %v1854_v39  ;;  %v1693_v33 = vmul.f32 %v4419_v34, %v5079_v9  ;;  %v4432_v38 = vpop.eup %3358  ;;  %3362 = vrsqrt.f32 %v1651_v0  ;;  %v1555_v3 = vmul.f32 %v4421_v54, %v4421_v54  ;;  %2443 = vmatprep.subr.bf16.mxu0 %v3180_v32  ;;  %v5081_v6 = vld [vmem:[#allocation26_spill] sm:$0xff] }
 0x266   : > { %v1692_v16 = vmul.f32 %v4419_v34, %v5080_v20  ;;  %v1570_v35 = vsub.f32 %v1538_v28, %v1554_v53  ;;  %v1499_v31 = vpop.xlane.xlu1 %1498  ;;  %2368 = vmatprep.mubr.bf16.mxu0 %v1979_v29  ;;  %v1697_v42 = vmul.f32 %v4432_v38, %v5082_v44  ;;  %v5083_v28 = vsub.f32 %v5063_v61, %v4330_v37  ;;  %v5084_v29 = vld [vmem:[#allocation25_spill] sm:$0xff] }
 0x267   : > { %v1343_v40 = vpop.xlane.xlu0 %1342  ;;  %v1778_v10 = vmul.f32 %v4273_v2, %v1693_v33  ;;  %v1539_v0 = vmul.f32 0.001953125, %v1499_v31  ;;  %2369 = vmatmul.mubr.bf16.gmra.mrb[4].mxu0 %v1978_v15  ;;  %v3186_v15 = vld [vmem:[#allocation4 + $0x144] ss:$8 sps:$4 sm:$0xff]   ;;  %v5090_v63 = vsub.f32 %v5067_v5, %v4351_v7 }
 0x268   : > { %v1696_v53 = vmul.f32 %v4432_v38, %v5083_v28  ;;  %v1777_v32 = vmul.f32 %v4281_v23, %v1692_v16  ;;  %v1652_v20 = vadd.f32 1e-05, %v1570_v35  ;;  %v4448_v9 = vmul.f32 0.001953125, %v1343_v40  ;;  %2444 = vmatpush1.bf16.msra.mxu0 %v3178_v43  ;;  %v5085_v31 = vld [vmem:[#allocation28_spill] sm:$0xff] }
 0x269   : > { %v1782_v44 = vmul.f32 %v4273_v2, %v1697_v42  ;;  %v1863_v33 = vadd.f32 %v4276_v49, %v1778_v10  ;;  %v1571_v16 = vsub.f32 %v1539_v0, %v1555_v3  ;;  %2445 = vmatprep.subr.bf16.mxu0 %v3183_v11  ;;  %v4466_v3 = vadd.f32 %v4231_v60, %v4398_v26 }
 0x26a   : > { %v1781_v61 = vmul.f32 %v4281_v23, %v1696_v53  ;;  %v1862_v28 = vadd.f32 %v4284_v18, %v1777_v32  ;;  %3364 = vrsqrt.f32 %v1652_v20  ;;  %v1556_v35 = vmul.f32 %v4448_v9, %v4448_v9  ;;  %v1348_v43 = vpop.xlane.xlu1 %1347  ;;  %v5086_v53 = vld [vmem:[#allocation27_spill] sm:$0xff] }
 0x26b   : > { %v1504_v39 = vpop.xlane.xlu0 %1503  ;;  %v1867_v42 = vadd.f32 %v4276_v49, %v1782_v44  ;;  %5087 = vst [vmem:[#allocation12_spill] sm:$0xff] %v4466_v3  ;;  %v1653_v11 = vadd.f32 1e-05, %v1571_v16  ;;  %v4470_v20 = vmul.f32 0.001953125, %v1348_v43  ;;  %v4473_v40 = vadd.f32 %v4231_v60, %v1767_v59 }
 0x26c   : > { %v1866_v10 = vadd.f32 %v4284_v18, %v1781_v61  ;;  %v4468_v32 = vpop.eup %3360  ;;  %v1540_v0 = vmul.f32 0.001953125, %v1504_v39  ;;  %2446 = vmatpush1.bf16.msra.mxu0 %v3181_v24  ;;  %v3184_v61 = vld [vmem:[#allocation4 + $0x140] ss:$8 sps:$4 sm:$0xff]   ;;  %v5091_v26 = vsub.f32 %v5068_v14, %v4351_v7  ;;  %v3189_v39 = vld [vmem:[#allocation4 + $0x154] ss:$8 sps:$4 sm:$0xff]  }
 0x26d   : > { %5088 = vst [vmem:[#allocation11_spill] sm:$0xff] %v4468_v32  ;;  %5089 = vst [vmem:[#allocation14_spill] sm:$0xff] %v4473_v40  ;;  %v1983_v44 = vpack.c.bf16 %v1867_v42, %v1863_v33  ;;  %v1701_v57 = vmul.f32 %v4468_v32, %v5090_v63  ;;  %3366 = vrsqrt.f32 %v1653_v11  ;;  %v1557_v59 = vmul.f32 %v4470_v20, %v4470_v20  ;;  %v5092_v24 = vld [vmem:[#allocation30_spill] sm:$0xff]  ;;  %v5093_v14 = vld [vmem:[#allocation29_spill] sm:$0xff] }
 0x26e   : > { %v1982_v36 = vpack.c.bf16 %v1866_v10, %v1862_v28  ;;  %v1700_v16 = vmul.f32 %v4468_v32, %v5091_v26  ;;  %v1572_v43 = vsub.f32 %v1540_v0, %v1556_v35  ;;  %2447 = vmatprep.subr.bf16.mxu0 %v3186_v15  ;;  %v1509_v28 = vpop.xlane.xlu1 %1508  ;;  %v5096_v10 = vsub.f32 %v5071_v50, %v4358_v17  ;;  %v5098_v50 = vld [vmem:[#allocation32_spill] sm:$0xff] }
 0x26f   : > { %2378 = vmatprep.mubr.bf16.mxu0 %v1983_v44  ;;  %v1353_v5 = vpop.xlane.xlu0 %1352  ;;  %v1786_v63 = vmul.f32 %v4273_v2, %v1701_v57  ;;  %v4493_v11 = vpop.eup %3362  ;;  %v1541_v0 = vmul.f32 0.001953125, %v1509_v28  ;;  %v5095_v44 = vsub.f32 %v3997_v55, %v4269_v13  ;;  %v3190_v40 = vld [vmem:[#allocation4 + $0x160] ss:$8 sps:$4 sm:$0xff]  }
 0x270   : > { %v1785_v42 = vmul.f32 %v4281_v23, %v1700_v16  ;;  %5094 = vst [vmem:[#allocation13_spill] sm:$0xff] %v4493_v11  ;;  %v1654_v15 = vadd.f32 1e-05, %v1572_v43  ;;  %v4495_v26 = vmul.f32 0.001953125, %v1353_v5  ;;  %2379 = vmatmul.mubr.bf16.gmra.mrb[8].mxu0 %v1982_v36  ;;  %v3187_v16 = vld [vmem:[#allocation4 + $0x150] ss:$8 sps:$4 sm:$0xff]   ;;  %v1705_v33 = vmul.f32 %v4493_v11, %v5096_v10 }
 0x271   : > { %v1687_v57 = vmul.f32 %v4362_v51, %v5095_v44  ;;  %2448 = vmatpush1.bf16.msra.mxu0 %v3184_v61  ;;  %v1871_v35 = vadd.f32 %v4276_v49, %v1786_v63  ;;  %v5097_v43 = vsub.f32 %v5072_v27, %v4358_v17  ;;  %v1573_v55 = vsub.f32 %v1541_v0, %v1557_v59  ;;  %v3192_v5 = vld [vmem:[#allocation4 + $0x164] ss:$8 sps:$4 sm:$0xff]  }
 0x272   : > { %v1870_v36 = vadd.f32 %v4284_v18, %v1785_v42  ;;  %3368 = vrsqrt.f32 %v1654_v15  ;;  %v1558_v61 = vmul.f32 %v4495_v26, %v4495_v26  ;;  %2449 = vmatprep.subr.bf16.mxu0 %v3189_v39  ;;  %v1790_v63 = vmul.f32 %v4273_v2, %v1705_v33 }
 0x273   : > { %v1704_v28 = vmul.f32 %v4493_v11, %v5097_v43  ;;  %v1358_v10 = vpop.xlane.xlu1 %1357  ;;  %v1514_v3 = vpop.xlane.xlu0 %1513  ;;  %v5099_v43 = vld [vmem:[#allocation31_spill] sm:$0xff]  ;;  %v5100_v59 = vsub.f32 %v4010_v52, %v4278_v4  ;;  %v1655_v39 = vadd.f32 1e-05, %v1573_v55  ;;  %v4528_v11 = vmul.f32 %v4289_v19, %v1687_v57 }
 0x274   : > { %v4523_v15 = vpop.eup %3364  ;;  %v4525_v0 = vmul.f32 0.001953125, %v1358_v10  ;;  %v1542_v44 = vmul.f32 0.001953125, %v1514_v3  ;;  %v1875_v33 = vadd.f32 %v4276_v49, %v1790_v63  ;;  %v5101_v52 = vsub.f32 %v5077_v21, %v4400_v56  ;;  %v5103_v63 = vld [vmem:[#allocation34_spill] sm:$0xff] }
 0x275   : > { %v1789_v27 = vmul.f32 %v4281_v23, %v1704_v28  ;;  %v1691_v42 = vmul.f32 %v4382_v62, %v5100_v59  ;;  %2450 = vmatpush1.bf16.msra.mxu0 %v3187_v16  ;;  %v5102_v55 = vsub.f32 %v5078_v1, %v4400_v56  ;;  %3370 = vrsqrt.f32 %v1655_v39  ;;  %v3195_v16 = vld [vmem:[#allocation4 + $0x174] ss:$8 sps:$4 sm:$0xff]  }
 0x276   : > { %v1709_v59 = vmul.f32 %v4523_v15, %v5101_v52  ;;  %v1574_v3 = vsub.f32 %v1542_v44, %v1558_v61  ;;  %v1559_v57 = vmul.f32 %v4525_v0, %v4525_v0  ;;  %2451 = vmatprep.subr.bf16.mxu0 %v3192_v5  ;;  %v1987_v17 = vpack.c.bf16 %v1875_v33, %v1871_v35  ;;  %v5104_v5 = vld [vmem:[#allocation33_spill] sm:$0xff] }
 0x277   : > { %v1874_v28 = vadd.f32 %v4284_v18, %v1789_v27  ;;  %v1708_v10 = vmul.f32 %v4523_v15, %v5102_v55  ;;  %v1519_v32 = vpop.xlane.xlu1 %1518  ;;  %v1363_v21 = vpop.xlane.xlu0 %1362  ;;  %v3193_v27 = vld [vmem:[#allocation4 + $0x170] ss:$8 sps:$4 sm:$0xff]   ;;  %v5105_v35 = vsub.f32 %v5081_v6, %v4421_v54 }
 0x278   : > { %v1794_v52 = vmul.f32 %v4273_v2, %v1709_v59  ;;  %v4546_v56 = vpop.eup %3366  ;;  %v1656_v39 = vadd.f32 1e-05, %v1574_v3  ;;  %v1543_v61 = vmul.f32 0.001953125, %v1519_v32  ;;  %v4548_v44 = vmul.f32 0.001953125, %v1363_v21  ;;  %2388 = vmatprep.mubr.bf16.mxu0 %v1987_v17 }
 0x279   : > { %v1986_v7 = vpack.c.bf16 %v1874_v28, %v1870_v36  ;;  %v1793_v1 = vmul.f32 %v4281_v23, %v1708_v10  ;;  %2452 = vmatpush1.bf16.msra.mxu0 %v3190_v40  ;;  %v1713_v36 = vmul.f32 %v4546_v56, %v5105_v35  ;;  %v5106_v28 = vsub.f32 %v5084_v29, %v4421_v54  ;;  %v3198_v10 = vld [vmem:[#allocation4 + $0x184] ss:$8 sps:$4 sm:$0xff]  }
 0x27a   : > { %v1879_v33 = vadd.f32 %v4276_v49, %v1794_v52  ;;  %3372 = vrsqrt.f32 %v1656_v39  ;;  %v1575_v59 = vsub.f32 %v1543_v61, %v1559_v57  ;;  %v1560_v17 = vmul.f32 %v4548_v44, %v4548_v44  ;;  %2453 = vmatprep.subr.bf16.mxu0 %v3195_v16 }
 0x27b   : > { %v1712_v32 = vmul.f32 %v4546_v56, %v5106_v28  ;;  %2389 = vmatmul.mubr.bf16.gmra.mrb[12].mxu0 %v1986_v7  ;;  %v1878_v40 = vadd.f32 %v4284_v18, %v1793_v1  ;;  %v1368_v6 = vpop.xlane.xlu1 %1367  ;;  %v1524_v3 = vpop.xlane.xlu0 %1523  ;;  %v1798_v21 = vmul.f32 %v4273_v2, %v1713_v36  ;;  %v1776_v1 = vmul.f32 %v4289_v19, %v1691_v42  ;;  %v3196_v28 = vld [vmem:[#allocation4 + $0x180] ss:$8 sps:$4 sm:$0xff]  }
 0x27c   : > { %v4570_v7 = vpop.eup %3368  ;;  %v1657_v39 = vadd.f32 1e-05, %v1575_v59  ;;  %v4572_v61 = vmul.f32 0.001953125, %v1368_v6  ;;  %v1544_v16 = vmul.f32 0.001953125, %v1524_v3  ;;  %v5108_v57 = vsub.f32 %v5086_v53, %v4448_v9 }
 0x27d   : > { %v1797_v52 = vmul.f32 %v4281_v23, %v1712_v32  ;;  %2454 = vmatpush1.bf16.msra.mxu0 %v3193_v27  ;;  %v1883_v35 = vadd.f32 %v4276_v49, %v1798_v21  ;;  %v5107_v32 = vsub.f32 %v5085_v31, %v4448_v9  ;;  %v3201_v27 = vld [vmem:[#allocation4 + $0x194] ss:$8 sps:$4 sm:$0xff]  }
 0x27e   : > { %v1716_v59 = vmul.f32 %v4570_v7, %v5108_v57  ;;  %3374 = vrsqrt.f32 %v1657_v39  ;;  %v1576_v6 = vsub.f32 %v1544_v16, %v1560_v17  ;;  %v1561_v42 = vmul.f32 %v4572_v61, %v4572_v61  ;;  %2455 = vmatprep.subr.bf16.mxu0 %v3198_v10  ;;  %v3199_v16 = vld [vmem:[#allocation4 + $0x190] ss:$8 sps:$4 sm:$0xff]  }
 0x27f   : > { %v1882_v36 = vadd.f32 %v4284_v18, %v1797_v52  ;;  %v1717_v29 = vmul.f32 %v4570_v7, %v5107_v32  ;;  %v1641_v3 = vsub.f32 %v4190_v48, %v4572_v61  ;;  %v1529_v21 = vpop.xlane.xlu1 %1528  ;;  %v1991_v52 = vpack.c.bf16 %v1883_v35, %v1879_v33  ;;  %v4591_v53 = vpop.eup %3370 }
 0x280   : > { %v1801_v55 = vmul.f32 %v4281_v23, %v1716_v59  ;;  %v1658_v57 = vadd.f32 1e-05, %v1576_v6  ;;  %v1545_v39 = vmul.f32 0.001953125, %v1529_v21  ;;  %v1640_v17 = vsub.f32 %v4101_v8, %v4572_v61 }
 0x281   : > { %v1990_v31 = vpack.c.bf16 %v1882_v36, %v1878_v40  ;;  %v1802_v32 = vmul.f32 %v4273_v2, %v1717_v29  ;;  %v4597_v10 = vadd.f32 %v4292_v25, %v4528_v11  ;;  %2398 = vmatprep.mubr.bf16.mxu0 %v1991_v52  ;;  %2456 = vmatpush1.bf16.msra.mxu0 %v3196_v28  ;;  %v3204_v28 = vld [vmem:[#allocation4 + $0x1a4] ss:$8 sps:$4 sm:$0xff]  }
 0x282   : > { %v5109_v33 = vsub.f32 %v5092_v24, %v4470_v20  ;;  %v5110_v35 = vsub.f32 %v5093_v14, %v4470_v20  ;;  %3376 = vrsqrt.f32 %v1658_v57  ;;  %v1577_v59 = vsub.f32 %v1545_v39, %v1561_v42  ;;  %2457 = vmatprep.subr.bf16.mxu0 %v3201_v27 }
 0x283   : > { %v1887_v29 = vadd.f32 %v4276_v49, %v1802_v32  ;;  %2399 = vmatmul.mubr.bf16.gmra.mrb[16].mxu0 %v1990_v31  ;;  %v1886_v11 = vadd.f32 %v4284_v18, %v1801_v55  ;;  %v4610_v6 = vadd.f32 %v4292_v25, %v1776_v1  ;;  %v5111_v52 = vsub.f32 %v3993_v46, %v4269_v13 }
 0x284   : > { %v1721_v40 = vmul.f32 %v4591_v53, %v5109_v33  ;;  %v1720_v36 = vmul.f32 %v4591_v53, %v5110_v35  ;;  %v5112_v42 = vsub.f32 %v5059_v22, %v4278_v4  ;;  %v4622_v31 = vpop.eup %3372  ;;  %v1659_v55 = vadd.f32 1e-05, %v1577_v59  ;;  %v3202_v4 = vld [vmem:[#allocation4 + $0x1a0] ss:$8 sps:$4 sm:$0xff]  }
 0x285   : > { %v1686_v14 = vmul.f32 %v4362_v51, %v5111_v52  ;;  %v1981_v1 = vpack.c.bf16 %v4610_v6, %v4597_v10  ;;  %v1603_v32 = vsub.f32 %v4043_v41, %v4330_v37  ;;  %v5113_v57 = vsub.f32 %v4036_v12, %v4318_v47  ;;  %2458 = vmatpush1.bf16.msra.mxu0 %v3199_v16  ;;  %v3207_v12 = vld [vmem:[#allocation4 + $0x1b4] ss:$8 sps:$4 sm:$0xff]  }
 0x286   : > { %v1806_v24 = vmul.f32 %v4273_v2, %v1721_v40  ;;  %v1805_v21 = vmul.f32 %v4281_v23, %v1720_v36  ;;  %v1690_v27 = vmul.f32 %v4382_v62, %v5112_v42  ;;  %v5114_v51 = vsub.f32 %v5098_v50, %v4495_v26  ;;  %2459 = vmatprep.subr.bf16.mxu0 %v3204_v28 }
 0x287   : > { %v1695_v46 = vmul.f32 %v4419_v34, %v5113_v57  ;;  %v5115_v39 = vsub.f32 %v5099_v43, %v4495_v26  ;;  %3378 = vrsqrt.f32 %v1659_v55  ;;  %v1771_v16 = vmul.f32 %v4220_v30, %v1686_v14  ;;  %v3210_v57 = vld [vmem:[#allocation4 + $0x1c4] ss:$8 sps:$4 sm:$0xff]  }
 0x288   : > { %v1891_v13 = vadd.f32 %v4276_v49, %v1806_v24  ;;  %v1890_v22 = vadd.f32 %v4284_v18, %v1805_v21  ;;  %v1725_v62 = vmul.f32 %v4622_v31, %v5114_v51  ;;  %v1775_v33 = vmul.f32 %v4220_v30, %v1690_v27  ;;  %v4647_v24 = vpop.eup %3374 }
 0x289   : > { %v1724_v41 = vmul.f32 %v4622_v31, %v5115_v39  ;;  %v1699_v40 = vmul.f32 %v4432_v38, %v1603_v32  ;;  %v4650_v43 = vadd.f32 %v4231_v60, %v1771_v16  ;;  %v1780_v21 = vmul.f32 %v4289_v19, %v1695_v46  ;;  %2460 = vmatpush1.bf16.msra.mxu0 %v3202_v4  ;;  %v5119_v39 = vld [vmem:[#allocation39_spill] sm:$0xff]  ;;  %v5121_v16 = vld [vmem:[#allocation41_spill] sm:$0xff] }
 0x28a   : > { %v1995_v35 = vpack.c.bf16 %v1891_v13, %v1887_v29  ;;  %v1994_v36 = vpack.c.bf16 %v1890_v22, %v1886_v11  ;;  %v1810_v50 = vmul.f32 %v4273_v2, %v1725_v62  ;;  %v4653_v28 = vadd.f32 %v4231_v60, %v1775_v33  ;;  %v3205_v29 = vld [vmem:[#allocation4 + $0x1b0] ss:$8 sps:$4 sm:$0xff]   ;;  %2461 = vmatprep.subr.bf16.mxu0 %v3207_v12  ;;  %v5120_v12 = vld [vmem:[#allocation8_spill] sm:$0xff] }
 0x28b   : > { %v1809_v59 = vmul.f32 %v4281_v23, %v1724_v41  ;;  %v1784_v52 = vmul.f32 %v4289_v19, %v1699_v40  ;;  %v5116_v11 = vsub.f32 %v5103_v63, %v4525_v0  ;;  %v5117_v27 = vsub.f32 %v5104_v5, %v4525_v0  ;;  %v5118_v5 = vld [vmem:[#allocation38_spill] sm:$0xff] }
 0x28c   : > { %2408 = vmatprep.mubr.bf16.mxu0 %v1995_v35  ;;  %v1895_v42 = vadd.f32 %v4276_v49, %v1810_v50  ;;  %v1980_v46 = vpack.c.bf16 %v4653_v28, %v4650_v43  ;;  %v4670_v13 = vadd.f32 %v4292_v25, %v1780_v21  ;;  %v1598_v51 = vsub.f32 %v5118_v5, %v4318_v47  ;;  %v4679_v62 = vpop.eup %3376  ;;  %v5122_v40 = vld [vmem:[#allocation10_spill] sm:$0xff]  ;;  %v5123_v35 = vld [vmem:[#allocation43_spill] sm:$0xff]  ;;  %v5124_v50 = vld [vmem:[#allocation40_spill] sm:$0xff] }
 0x28d   : > { %v1729_v14 = vmul.f32 %v4647_v24, %v5116_v11  ;;  %v1728_v55 = vmul.f32 %v4647_v24, %v5117_v27  ;;  %2409 = vmatmul.mubr.bf16.gmra.mrb[20].mxu0 %v1994_v36  ;;  %v1894_v32 = vadd.f32 %v4284_v18, %v1809_v59  ;;  %v4675_v4 = vadd.f32 %v4292_v25, %v1784_v52  ;;  %v3208_v47 = vld [vmem:[#allocation4 + $0x1c0] ss:$8 sps:$4 sm:$0xff]   ;;  %v5127_v5 = vld [vmem:[#allocation11_spill] sm:$0xff] }
 0x28e   : > { %v1602_v41 = vsub.f32 %v5119_v39, %v4330_v37  ;;  %v1607_v33 = vsub.f32 %v5121_v16, %v5120_v12  ;;  %v1611_v36 = vsub.f32 %v5123_v35, %v5122_v40  ;;  %v1606_v59 = vsub.f32 %v5124_v50, %v5120_v12  ;;  %2462 = vmatpush1.bf16.msra.mxu0 %v3205_v29 }
 0x28f   : > { %v1814_v63 = vmul.f32 %v4273_v2, %v1729_v14  ;;  %v1813_v22 = vmul.f32 %v4281_v23, %v1728_v55  ;;  %v5125_v11 = vsub.f32 %v4003_v45, %v4548_v44  ;;  %v5126_v14 = vsub.f32 %v3957_v58, %v4548_v44  ;;  %2463 = vmatprep.subr.bf16.mxu0 %v3210_v57  ;;  %v3213_v55 = vld [vmem:[#allocation4 + $0x1d4] ss:$8 sps:$4 sm:$0xff]  }
 0x290   : > { %v1985_v29 = vpack.c.bf16 %v4675_v4, %v4670_v13  ;;  %v1703_v39 = vmul.f32 %v5127_v5, %v1607_v33  ;;  %v3216_v33 = vld [vmem:[#allocation4 + $0x1e4] ss:$8 sps:$4 sm:$0xff]  }
 0x291   : > { %v1899_v21 = vadd.f32 %v4276_v49, %v1814_v63  ;;  %v1898_v52 = vadd.f32 %v4284_v18, %v1813_v22  ;;  %v1733_v37 = vmul.f32 %v4679_v62, %v5125_v11  ;;  %v1732_v27 = vmul.f32 %v4679_v62, %v5126_v14  ;;  %v4706_v58 = vpop.eup %3378  ;;  %v5128_v11 = vld [vmem:[#allocation13_spill] sm:$0xff] }
 0x292   : > { %v1694_v63 = vmul.f32 %v4419_v34, %v1598_v51  ;;  %v1698_v22 = vmul.f32 %v4432_v38, %v1602_v41  ;;  %v1707_v14 = vmul.f32 %v5128_v11, %v1611_v36  ;;  %v1788_v34 = vmul.f32 %v4289_v19, %v1703_v39  ;;  %2464 = vmatpush1.bf16.msra.mxu0 %v3208_v47  ;;  %v3211_v38 = vld [vmem:[#allocation4 + $0x1d0] ss:$8 sps:$4 sm:$0xff]   ;;  %v3214_v39 = vld [vmem:[#allocation4 + $0x1e0] ss:$8 sps:$4 sm:$0xff]  }
 0x293   : > { %v1999_v12 = vpack.c.bf16 %v1899_v21, %v1895_v42  ;;  %v1998_v45 = vpack.c.bf16 %v1898_v52, %v1894_v32  ;;  %v1818_v16 = vmul.f32 %v4273_v2, %v1733_v37  ;;  %v1817_v35 = vmul.f32 %v4281_v23, %v1732_v27  ;;  %2465 = vmatprep.subr.bf16.mxu0 %v3213_v55  ;;  %v5129_v47 = vld [vmem:[#allocation42_spill] sm:$0xff]  ;;  %v5130_v55 = vld [vmem:[#allocation35_spill] sm:$0xff] }
 0x294   : > { %v1779_v57 = vmul.f32 %v4220_v30, %v1694_v63  ;;  %v1783_v50 = vmul.f32 %v4220_v30, %v1698_v22  ;;  %v1737_v42 = vmul.f32 %v4706_v58, %v1641_v3  ;;  %v1736_v51 = vmul.f32 %v4706_v58, %v1640_v17  ;;  %v5131_v63 = vld [vmem:[#allocation46_spill] sm:$0xff] }
 0x295   : > { %2418 = vmatprep.mubr.bf16.mxu0 %v1999_v12  ;;  %v1903_v32 = vadd.f32 %v4276_v49, %v1818_v16  ;;  %v1902_v41 = vadd.f32 %v4284_v18, %v1817_v35  ;;  %v1792_v52 = vmul.f32 %v4289_v19, %v1707_v14  ;;  %v4732_v8 = vadd.f32 %v4292_v25, %v1788_v34  ;;  %v3219_v35 = vld [vmem:[#allocation4 + $0x1f4] ss:$8 sps:$4 sm:$0xff]  }
 0x296   : > { %2419 = vmatmul.mubr.bf16.gmra.mrb[24].mxu0 %v1998_v45  ;;  %v4723_v36 = vadd.f32 %v4231_v60, %v1779_v57  ;;  %v4726_v21 = vadd.f32 %v4231_v60, %v1783_v50  ;;  %v1822_v48 = vmul.f32 %v4273_v2, %v1737_v42  ;;  %v1821_v3 = vmul.f32 %v4281_v23, %v1736_v51  ;;  %v5132_v45 = vld [vmem:[#allocation47_spill] sm:$0xff]  ;;  %v5133_v57 = vld [vmem:[#allocation44_spill] sm:$0xff]  ;;  %v5134_v51 = vld [vmem:[#allocation45_spill] sm:$0xff] }
 0x297   : > { %v1610_v37 = vsub.f32 %v5129_v47, %v5122_v40  ;;  %v1702_v27 = vmul.f32 %v5127_v5, %v1606_v59  ;;  %v1615_v22 = vsub.f32 %v5131_v63, %v5130_v55  ;;  %2466 = vmatpush1.bf16.msra.mxu0 %v3211_v38  ;;  %v4744_v12 = vadd.f32 %v4292_v25, %v1792_v52 }
 0x298   : > { %v1984_v17 = vpack.c.bf16 %v4726_v21, %v4723_v36  ;;  %v1907_v2 = vadd.f32 %v4276_v49, %v1822_v48  ;;  %v1906_v23 = vadd.f32 %v4284_v18, %v1821_v3  ;;  %v1619_v16 = vsub.f32 %v5132_v45, %v4421_v54  ;;  %2467 = vmatprep.subr.bf16.mxu0 %v3216_v33  ;;  %v3217_v48 = vld [vmem:[#allocation4 + $0x1f0] ss:$8 sps:$4 sm:$0xff]   ;;  %v5135_v3 = vld [vmem:[#allocation49_spill] sm:$0xff] }
 0x299   : > { %v1706_v40 = vmul.f32 %v5128_v11, %v1610_v37  ;;  %v1787_v59 = vmul.f32 %v4220_v30, %v1702_v27  ;;  %v1711_v5 = vmul.f32 %v4523_v15, %v1615_v22  ;;  %v1614_v49 = vsub.f32 %v5133_v57, %v5130_v55  ;;  %v5136_v27 = vld [vmem:[#allocation9_spill] sm:$0xff]  ;;  %v5137_v55 = vld [vmem:[#allocation36_spill] sm:$0xff] }
 0x29a   : > { %v2003_v50 = vpack.c.bf16 %v1907_v2, %v1903_v32  ;;  %v2002_v18 = vpack.c.bf16 %v1906_v23, %v1902_v41  ;;  %v1989_v14 = vpack.c.bf16 %v4744_v12, %v4732_v8  ;;  %v1715_v34 = vmul.f32 %v4546_v56, %v1619_v16  ;;  %v5139_v2 = vld [vmem:[#allocation51_spill] sm:$0xff] }
 0x29b   : > { %v1791_v38 = vmul.f32 %v4220_v30, %v1706_v40  ;;  %v4758_v42 = vadd.f32 %v4231_v60, %v1787_v59  ;;  %v1796_v11 = vmul.f32 %v4289_v19, %v1711_v5  ;;  %v1618_v33 = vsub.f32 %v5134_v51, %v4421_v54  ;;  %2468 = vmatpush1.bf16.msra.mxu0 %v3214_v39  ;;  %v5141_v40 = vld [vmem:[#allocation50_spill] sm:$0xff] }
 0x29c   : > { %2428 = vmatprep.mubr.bf16.mxu0 %v2003_v50  ;;  %v1800_v32 = vmul.f32 %v4289_v19, %v1715_v34  ;;  %v1710_v41 = vmul.f32 %v4523_v15, %v1614_v49  ;;  %v1623_v52 = vsub.f32 %v5135_v3, %v4448_v9  ;;  %2469 = vmatprep.subr.bf16.mxu0 %v3219_v35 }
 0x29d   : > { %v4768_v47 = vadd.f32 %v4231_v60, %v1791_v38  ;;  %v4771_v37 = vadd.f32 %v4292_v25, %v1796_v11  ;;  %v1714_v54 = vmul.f32 %v4546_v56, %v1618_v33  ;;  %v5138_v63 = vpack.c.bf16 %v5136_v27, %v5137_v55  ;;  %v5140_v56 = vld [vmem:[#allocation48_spill] sm:$0xff]  ;;  %v5143_v33 = vld [vmem:[#allocation55_spill] sm:$0xff]  ;;  %v5145_v27 = vld [vmem:[#allocation54_spill] sm:$0xff] }
 0x29e   : > { %2429 = vmatmul.mubr.bf16.gmra.mrb[28].mxu0 %v2002_v18  ;;  %v4778_v22 = vadd.f32 %v4292_v25, %v1800_v32  ;;  %v1795_v15 = vmul.f32 %v4220_v30, %v1710_v41  ;;  %v1627_v23 = vsub.f32 %v5139_v2, %v4470_v20  ;;  %v1719_v39 = vmul.f32 %v4570_v7, %v1623_v52  ;;  %v5144_v32 = vld [vmem:[#allocation52_spill] sm:$0xff] }
 0x29f   : > { %2471 = vmatprep.mubr.bf16.mxu0 %v5138_v63  ;;  %v1988_v45 = vpack.c.bf16 %v4768_v47, %v4758_v42  ;;  %v1799_v16 = vmul.f32 %v4220_v30, %v1714_v54  ;;  %v1622_v35 = vsub.f32 %v5140_v56, %v4448_v9  ;;  %v1626_v59 = vsub.f32 %v5141_v40, %v4470_v20  ;;  %v5142_v9 = vld [vmem:[#allocation53_spill] sm:$0xff] }
 0x2a0   : > { %2470 = vmatpush1.bf16.msra.mxu0 %v3217_v48  ;;  %v1993_v5 = vpack.c.bf16 %v4778_v22, %v4771_v37  ;;  %v1880_v57 = vadd.f32 %v4231_v60, %v1795_v15  ;;  %v1723_v49 = vmul.f32 %v4591_v53, %v1627_v23  ;;  %v1804_v50 = vmul.f32 %v4289_v19, %v1719_v39  ;;  %v5146_v22 = vld [vmem:[#allocation14_spill] sm:$0xff]  ;;  %v5147_v15 = vld [vmem:[#allocation12_spill] sm:$0xff] }
 0x2a1   : > { %v1884_v18 = vadd.f32 %v4231_v60, %v1799_v16  ;;  %v1718_v34 = vmul.f32 %v4570_v7, %v1622_v35  ;;  %v1722_v38 = vmul.f32 %v4591_v53, %v1626_v59  ;;  %v1631_v11 = vsub.f32 %v5142_v9, %v4495_v26  ;;  %v5149_v16 = vld [vmem:[#allocation57_spill] sm:$0xff] }
 0x2a2   : > { %v1808_v20 = vmul.f32 %v4289_v19, %v1723_v49  ;;  %v1889_v51 = vadd.f32 %v4292_v25, %v1804_v50  ;;  %v1635_v48 = vsub.f32 %v5143_v33, %v4525_v0  ;;  %v1630_v41 = vsub.f32 %v5144_v32, %v4495_v26  ;;  %v5150_v49 = vld [vmem:[#allocation59_spill] sm:$0xff] }
 0x2a3   : > { %v1992_v3 = vpack.c.bf16 %v1884_v18, %v1880_v57  ;;  %v1803_v52 = vmul.f32 %v4220_v30, %v1718_v34  ;;  %v1807_v7 = vmul.f32 %v4220_v30, %v1722_v38  ;;  %v1727_v53 = vmul.f32 %v4622_v31, %v1631_v11  ;;  %v5152_v11 = vld [vmem:[#allocation58_spill] sm:$0xff] }
 0x2a4   : > { %v1893_v37 = vadd.f32 %v4292_v25, %v1808_v20  ;;  %v1731_v54 = vmul.f32 %v4647_v24, %v1635_v48  ;;  %v1634_v55 = vsub.f32 %v5145_v27, %v4525_v0  ;;  %v1726_v63 = vmul.f32 %v4622_v31, %v1630_v41 }
 0x2a5   : > { %v5148_v2 = vpack.c.bf16 %v5146_v22, %v5147_v15  ;;  %v1888_v26 = vadd.f32 %v4231_v60, %v1803_v52  ;;  %v1892_v23 = vadd.f32 %v4231_v60, %v1807_v7  ;;  %v1812_v39 = vmul.f32 %v4289_v19, %v1727_v53 }
 0x2a6   : > { %v1639_v56 = vsub.f32 %v5149_v16, %v4548_v44  ;;  %v1997_v0 = vpack.c.bf16 %v1893_v37, %v1889_v51  ;;  %v1816_v31 = vmul.f32 %v4289_v19, %v1731_v54  ;;  %v1730_v35 = vmul.f32 %v4647_v24, %v1634_v55 }
 0x2a7   : > { %2472 = vmatmul.mubr.bf16.vlgmr.msra.gmra.mrb[0].mxu0 %v5148_v2  ;;  %v1811_v40 = vmul.f32 %v4220_v30, %v1726_v63  ;;  %v1996_v59 = vpack.c.bf16 %v1892_v23, %v1888_v26  ;;  %v1897_v57 = vadd.f32 %v4292_v25, %v1812_v39  ;;  %v1643_v50 = vsub.f32 %v5150_v49, %v4572_v61 }
 0x2a8   : > { %2481 = vmatprep.mubr.bf16.mxu0 %v1981_v1  ;;  %v1735_v18 = vmul.f32 %v4679_v62, %v1639_v56  ;;  %v1901_v34 = vadd.f32 %v4292_v25, %v1816_v31  ;;  %v1815_v10 = vmul.f32 %v4220_v30, %v1730_v35  ;;  %v5151_v1 = vld [vmem:[#allocation56_spill] sm:$0xff]  ;;  %v1642_v20 = vsub.f32 %v5152_v11, %v4572_v61 }
 0x2a9   : > { %v1896_v6 = vadd.f32 %v4231_v60, %v1811_v40  ;;  %v1638_v38 = vsub.f32 %v5151_v1, %v4548_v44  ;;  %v1739_v24 = vmul.f32 %v4706_v58, %v1643_v50 }
 0x2aa   : > { %v1820_v9 = vmul.f32 %v4289_v19, %v1735_v18  ;;  %v2001_v51 = vpack.c.bf16 %v1901_v34, %v1897_v57  ;;  %v1900_v33 = vadd.f32 %v4231_v60, %v1815_v10  ;;  %v1738_v41 = vmul.f32 %v4706_v58, %v1642_v20 }
 0x2ab   : > { %v1734_v48 = vmul.f32 %v4679_v62, %v1638_v38  ;;  %v1824_v32 = vmul.f32 %v4289_v19, %v1739_v24 }
 0x2ac   : > { %v2000_v52 = vpack.c.bf16 %v1900_v33, %v1896_v6  ;;  %v1905_v44 = vadd.f32 %v4292_v25, %v1820_v9  ;;  %v1823_v53 = vmul.f32 %v4220_v30, %v1738_v41 }
 0x2ad   : > { %v1819_v7 = vmul.f32 %v4220_v30, %v1734_v48  ;;  %v1909_v61 = vadd.f32 %v4292_v25, %v1824_v32 }
 0x2ae   : > { %v1908_v58 = vadd.f32 %v4231_v60, %v1823_v53 }
 0x2af   : > { %2482 = vmatmul.mubr.bf16.gmra.mrb[4].mxu0 %v1980_v46  ;;  %v1904_v19 = vadd.f32 %v4231_v60, %v1819_v7  ;;  %v2005_v62 = vpack.c.bf16 %v1909_v61, %v1905_v44 }
 0x2b0   : > { %2491 = vmatprep.mubr.bf16.mxu0 %v1985_v29 }
 0x2b1   : > { %v2004_v37 = vpack.c.bf16 %v1908_v58, %v1904_v19 }
 0x2b7   : > { %2492 = vmatmul.mubr.bf16.gmra.mrb[8].mxu0 %v1984_v17 }
 0x2b8   : > { %2501 = vmatprep.mubr.bf16.mxu0 %v1989_v14 }
 0x2bf   : > { %2502 = vmatmul.mubr.bf16.gmra.mrb[12].mxu0 %v1988_v45 }
 0x2c0   : > { %2511 = vmatprep.mubr.bf16.mxu0 %v1993_v5 }
 0x2c7   : > { %2512 = vmatmul.mubr.bf16.gmra.mrb[16].mxu0 %v1992_v3 }
 0x2c8   : > { %2521 = vmatprep.mubr.bf16.mxu0 %v1997_v0 }
 0x2cf   : > { %2522 = vmatmul.mubr.bf16.gmra.mrb[20].mxu0 %v1996_v59 }
 0x2d0   : > { %2531 = vmatprep.mubr.bf16.mxu0 %v2001_v51 }
 0x2d7   : > { %2532 = vmatmul.mubr.bf16.gmra.mrb[24].mxu0 %v2000_v52 }
 0x2d8   : > { %2541 = vmatprep.mubr.bf16.mxu0 %v2005_v62 }
 0x2df   : > { %2542 = vmatmul.mubr.bf16.gmra.mrb[28].mxu0 %v2004_v37 }
 0x37a   : > { %v2473_v30 = vpop.f32.mrb[0].mxu0 }
 0x37b   : > { %v2475_v60 = vpop.f32.mrb[1].mxu0 }
 0x37c   : > { %v2923_v25 = vpack.c.bf16 %v2475_v60, %v2473_v30  ;;  %v2477_v43 = vpop.f32.mrb[2].mxu0 }
 0x37d   : > { %v2479_v28 = vpop.f32.mrb[3].mxu0 }
 0x37e   : > { %2648 = vst [vmem:[%s4872_s13] sm:$0xff] %v2923_v25  ;;  %v2924_v46 = vpack.c.bf16 %v2479_v28, %v2477_v43 }
 0x380   : > { %2649 = vst [vmem:[%s4872_s13 + $0x8] sm:$0xff] %v2924_v46 }
 0x382   : > { %v2483_v13 = vpop.f32.mrb[4].mxu0 }
 0x383   : > { %v2485_v4 = vpop.f32.mrb[5].mxu0 }
 0x384   : > { %v2925_v29 = vpack.c.bf16 %v2485_v4, %v2483_v13  ;;  %v2487_v36 = vpop.f32.mrb[6].mxu0 }
 0x385   : > { %v2489_v21 = vpop.f32.mrb[7].mxu0 }
 0x386   : > { %2650 = vst [vmem:[%s4872_s13 + $0x10] sm:$0xff] %v2925_v29  ;;  %v2926_v8 = vpack.c.bf16 %v2489_v21, %v2487_v36 }
 0x388   : > { %2651 = vst [vmem:[%s4872_s13 + $0x18] sm:$0xff] %v2926_v8 }
 0x38a   : > { %v2493_v17 = vpop.f32.mrb[8].mxu0 }
 0x38b   : > { %v2495_v12 = vpop.f32.mrb[9].mxu0 }
 0x38c   : > { %v2927_v14 = vpack.c.bf16 %v2495_v12, %v2493_v17  ;;  %v2497_v42 = vpop.f32.mrb[10].mxu0 }
 0x38d   : > { %v2499_v47 = vpop.f32.mrb[11].mxu0 }
 0x38e   : > { %2652 = vst [vmem:[%s4872_s13 + $0x20] sm:$0xff] %v2927_v14  ;;  %v2928_v45 = vpack.c.bf16 %v2499_v47, %v2497_v42 }
 0x390   : > { %2653 = vst [vmem:[%s4872_s13 + $0x28] sm:$0xff] %v2928_v45 }
 0x392   : > { %v2503_v5 = vpop.f32.mrb[12].mxu0 }
 0x393   : > { %v2505_v3 = vpop.f32.mrb[13].mxu0 }
 0x394   : > { %v2929_v54 = vpack.c.bf16 %v2505_v3, %v2503_v5  ;;  %v2507_v27 = vpop.f32.mrb[14].mxu0 }
 0x395   : > { %v2509_v55 = vpop.f32.mrb[15].mxu0 }
 0x396   : > { %2654 = vst [vmem:[%s4872_s13 + $0x30] sm:$0xff] %v2929_v54  ;;  %v2930_v63 = vpack.c.bf16 %v2509_v55, %v2507_v27 }
 0x398   : > { %2655 = vst [vmem:[%s4872_s13 + $0x38] sm:$0xff] %v2930_v63 }
 0x39a   : > { %v2513_v22 = vpop.f32.mrb[16].mxu0 }
 0x39b   : > { %v2515_v15 = vpop.f32.mrb[17].mxu0 }
 0x39c   : > { %v2931_v2 = vpack.c.bf16 %v2515_v15, %v2513_v22  ;;  %v2517_v26 = vpop.f32.mrb[18].mxu0 }
 0x39d   : > { %v2519_v23 = vpop.f32.mrb[19].mxu0 }
 0x39e   : > { %2656 = vst [vmem:[%s4872_s13 + $0x40] sm:$0xff] %v2931_v2  ;;  %v2932_v39 = vpack.c.bf16 %v2519_v23, %v2517_v26 }
 0x3a0   : > { %2657 = vst [vmem:[%s4872_s13 + $0x48] sm:$0xff] %v2932_v39 }
 0x3a2   : > { %v2523_v16 = vpop.f32.mrb[20].mxu0 }
 0x3a3   : > { %v2525_v56 = vpop.f32.mrb[21].mxu0 }
 0x3a4   : > { %v2933_v0 = vpack.c.bf16 %v2525_v56, %v2523_v16  ;;  %v2527_v31 = vpop.f32.mrb[22].mxu0 }
 0x3a5   : > { %v2529_v35 = vpop.f32.mrb[23].mxu0 }
 0x3a6   : > { %2658 = vst [vmem:[%s4872_s13 + $0x50] sm:$0xff] %v2933_v0  ;;  %v2934_v40 = vpack.c.bf16 %v2529_v35, %v2527_v31 }
 0x3a8   : > { %2659 = vst [vmem:[%s4872_s13 + $0x58] sm:$0xff] %v2934_v40 }
 0x3aa   : > { %v2533_v59 = vpop.f32.mrb[24].mxu0 }
 0x3ab   : > { %v2535_v57 = vpop.f32.mrb[25].mxu0 }
 0x3ac   : > { %v2935_v49 = vpack.c.bf16 %v2535_v57, %v2533_v59  ;;  %v2537_v50 = vpop.f32.mrb[26].mxu0 }
 0x3ad   : > { %v2539_v18 = vpop.f32.mrb[27].mxu0 }
 0x3ae   : > { %2660 = vst [vmem:[%s4872_s13 + $0x60] sm:$0xff] %v2935_v49  ;;  %v2936_v34 = vpack.c.bf16 %v2539_v18, %v2537_v50 }
 0x3b0   : > { %2661 = vst [vmem:[%s4872_s13 + $0x68] sm:$0xff] %v2936_v34 }
 0x3b2   : > { %v2543_v10 = vpop.f32.mrb[28].mxu0 }
 0x3b3   : > { %v2545_v6 = vpop.f32.mrb[29].mxu0 }
 0x3b4   : > { %v2937_v1 = vpack.c.bf16 %v2545_v6, %v2543_v10  ;;  %v2547_v38 = vpop.f32.mrb[30].mxu0 }
 0x3b5   : > { %v2549_v24 = vpop.f32.mrb[31].mxu0 }
 0x3b6   : > { %2662 = vst [vmem:[%s4872_s13 + $0x70] sm:$0xff] %v2937_v1  ;;  %v2938_v9 = vpack.c.bf16 %v2549_v24, %v2547_v38 }
 0x3b8   : > { %2663 = vst [vmem:[%s4872_s13 + $0x78] sm:$0xff] %v2938_v9 }
 0x3b9 PF: > { %s17_s18 = sadd.s32 1, %s3450_s18  }
 0x3ba   : > { %p14_p2 = scmp.ge.s32.totalorder %s17_s18, 4  }
 0x3bc   :  { %16 = sbr.rel (!%p14_p2) target bundleno = 2 (0x2), region = 79 }
 0x3c3   :  { %2688 = vsyncpa [#allocation3], 1 }
 0x3c4   :  { %2690 = vsyncpa [#allocation3 + $0x1], 1 }
 0x3c5   :  { %2691 = vsyncpa [#allocation5], 1 }

</bundles_post_ra>
